<compile_context>
chip_gen: v6e
topology: v6e:2x2x1
jax: 0.10.0
libtpu: 0.0.40
codegen_flags: <defaults>
</compile_context>

<pallas_src>
import math

import jax
import jax.numpy as jnp
from jax.experimental import pallas as pl
from jax.experimental.pallas import tpu as pltpu

EMBED_DIM = 64                      # real embed dim (divisible by 8 heads)
NUM_HEADS = 8
HEAD_DIM = EMBED_DIM // NUM_HEADS   # 8
REDUCTION_RATIO = 4
HIDDEN_DIM = EMBED_DIM // REDUCTION_RATIO   # 16
LN_EPS = 1e-5

NUM_MATS = 7                        # wq wk wv wo w1 w2 wout (each stored as [64, 64])
NUM_VECS = 11                       # biases + LayerNorm params
ATTN_SCALE = 1.0 / math.sqrt(HEAD_DIM)
INV_D = 1.0 / EMBED_DIM
INV_SQRT2 = 1.0 / math.sqrt(2.0)

VMEM_ROW_BUDGET = 8 * 1024 * 1024   # live-intermediate budget per grid step

# rows of the packed bias / LayerNorm slab
_BQ, _BK, _BV, _BO, _LN1G, _LN1B, _B1, _B2, _LN2G, _LN2B, _BOUT = range(NUM_VECS)


def _layernorm(h, gamma, beta):
    # LayerNorm over the (fully real) 64-lane embed dim, f32 statistics.
    mean = jnp.sum(h, axis=-1, keepdims=True) * INV_D
    c = h - mean
    var = jnp.sum(c * c, axis=-1, keepdims=True) * INV_D
    return c * jax.lax.rsqrt(var + LN_EPS) * gamma + beta


def text_cond_kernel(sc_ref, x_ref, w_ref, v_ref, o_ref):
    alpha = sc_ref[0]
    beta = sc_ref[1]
    bt, s, d = x_ref.shape
    rows = bt * s

    x = x_ref[...].astype(jnp.float32).reshape(rows, d)      # [R, 64] f32 (residuals)
    xb = x.astype(jnp.bfloat16)                               # matmul operand
    vecs = v_ref[...]                                         # [11, 64] f32

    def wdot(a_bf16, idx):
        # a (bf16) @ pre-transposed bf16 weight `idx`, f32 accumulation on MXU.
        return jnp.dot(a_bf16, w_ref[idx], preferred_element_type=jnp.float32)

    def to_heads(m):                                          # [R,64] -> [bt*H, s, hd]
        t = m.reshape(bt, s, NUM_HEADS, HEAD_DIM).transpose(0, 2, 1, 3)
        return t.reshape(bt * NUM_HEADS, s, HEAD_DIM)

    # ---- multi-head self-attention (8 real heads only) ----
    q = to_heads(wdot(xb, 0) + vecs[_BQ:_BQ + 1])
    k = to_heads(wdot(xb, 1) + vecs[_BK:_BK + 1])
    v = to_heads(wdot(xb, 2) + vecs[_BV:_BV + 1])

    scores = jnp.einsum("nqd,nkd->nqk", q, k,
                        preferred_element_type=jnp.float32) * ATTN_SCALE
    scores = scores - jnp.max(scores, axis=-1, keepdims=True)
    p = jnp.exp(scores)
    p = p * pl.reciprocal(jnp.sum(p, axis=-1, keepdims=True), approx=True)
    ctx = jnp.einsum("nqk,nkd->nqd", p, v, preferred_element_type=jnp.float32)
    ctx = ctx.reshape(bt, NUM_HEADS, s, HEAD_DIM).transpose(0, 2, 1, 3).reshape(rows, d)

    attended = x + beta * (wdot(ctx.astype(jnp.bfloat16), 3) + vecs[_BO:_BO + 1])

    # ---- enhance_proj: LN -> Linear -> GELU(exact) -> Dropout(id) -> Linear -> LN ----
    h0 = _layernorm(attended, vecs[_LN1G:_LN1G + 1], vecs[_LN1B:_LN1B + 1])
    h1 = wdot(h0.astype(jnp.bfloat16), 4) + vecs[_B1:_B1 + 1]   # hidden lanes 16..63 are 0
    h1 = 0.5 * h1 * (1.0 + jax.lax.erf(h1 * INV_SQRT2))         # erf(0)=0 keeps padding 0
    h2 = wdot(h1.astype(jnp.bfloat16), 5) + vecs[_B2:_B2 + 1]
    enhanced = _layernorm(h2, vecs[_LN2G:_LN2G + 1], vecs[_LN2B:_LN2B + 1])

    # ---- residual mix + output_proj: Linear -> Tanh ----
    mix = x + alpha * enhanced + beta * attended
    out = jnp.tanh(wdot(mix.astype(jnp.bfloat16), 6) + vecs[_BOUT:_BOUT + 1])
    o_ref[...] = out.reshape(bt, s, d).astype(o_ref.dtype)


def init_params(key, embed_dim=EMBED_DIM, hidden_dim=HIDDEN_DIM):
    D, H = embed_dim, hidden_dim
    keys = jax.random.split(key, 12)
    n = lambda k, shape, s=0.05: (s * jax.random.normal(k, shape)).astype(jnp.float32)
    return {
        "wq": n(keys[0], (D, D)), "wk": n(keys[1], (D, D)), "wv": n(keys[2], (D, D)),
        "bq": jnp.zeros((1, D), jnp.float32),
        "bk": jnp.zeros((1, D), jnp.float32),
        "bv": jnp.zeros((1, D), jnp.float32),
        "wo": n(keys[3], (D, D)), "bo": n(keys[4], (1, D), 0.01),
        "ln1_g": jnp.ones((1, D), jnp.float32), "ln1_b": jnp.zeros((1, D), jnp.float32),
        "w1": n(keys[5], (H, D)), "b1": n(keys[6], (1, H), 0.01),
        "w2": n(keys[7], (D, H)), "b2": n(keys[8], (1, D), 0.01),
        "ln2_g": jnp.ones((1, D), jnp.float32), "ln2_b": jnp.zeros((1, D), jnp.float32),
        "wout": n(keys[9], (D, D)), "bout": n(keys[10], (1, D), 0.01),
        "alpha": jnp.array([0.1], jnp.float32),
        "beta": jnp.array([0.05], jnp.float32),
    }


def pack_params(params):
    """One-time param prep: pre-transpose to [in, out], pack as [7,64,64] bf16."""
    D, H = EMBED_DIM, HIDDEN_DIM

    def pad_t(w, rows, cols):
        # PyTorch Linear convention [out, in] -> stored transposed [in, out],
        # zero-padded to [D, D] only where the real in/out dim is the 16-wide hidden.
        return (jnp.zeros((D, D), jnp.float32)
                .at[:rows, :cols].set(jnp.asarray(w, jnp.float32).T))

    w_slab = jnp.stack([
        pad_t(params["wq"], D, D),
        pad_t(params["wk"], D, D),
        pad_t(params["wv"], D, D),
        pad_t(params["wo"], D, D),
        pad_t(params["w1"], D, H),     # output lanes 16..63 zero
        pad_t(params["w2"], H, D),     # contraction rows 16..63 zero
        pad_t(params["wout"], D, D),
    ]).astype(jnp.bfloat16)            # [7, 64, 64] bf16

    def pad_vec(v, n):
        return (jnp.zeros((D,), jnp.float32)
                .at[:n].set(jnp.asarray(v, jnp.float32).reshape(-1)))

    vec_slab = jnp.stack([
        pad_vec(params["bq"], D), pad_vec(params["bk"], D), pad_vec(params["bv"], D),
        pad_vec(params["bo"], D),
        pad_vec(params["ln1_g"], D), pad_vec(params["ln1_b"], D),
        pad_vec(params["b1"], H), pad_vec(params["b2"], D),
        pad_vec(params["ln2_g"], D), pad_vec(params["ln2_b"], D),
        pad_vec(params["bout"], D),
    ])                                 # [11, 64] f32

    scalars = jnp.concatenate([params["alpha"], params["beta"]]).astype(jnp.float32)
    return w_slab, vec_slab, scalars


def text_cond_processor(text_cond, packed):
    w_slab, vec_slab, scalars = packed
    orig_ndim = text_cond.ndim
    x = text_cond if orig_ndim == 3 else text_cond[:, None, :]
    B, S, D = x.shape
    assert D == EMBED_DIM

    # ---- VMEM-aware batch tiling ----
    # ~6 KiB of live f32/bf16 [rows,64] intermediates per row plus the per-head
    # S-wide score/prob tensors; budget ~8 MiB per grid step (well under the
    # 16 MiB scoped default on v5e, 32 MiB on v6e/v7x, 64 MiB physical on v7x).
    bytes_per_row = 6 * 1024 + 64 * S
    rows_cap = max(8, VMEM_ROW_BUDGET // bytes_per_row)
    bt = max(1, min(B, rows_cap // S)) if S <= rows_cap else 1
    # TODO(synk): no sequence tiling - a single grid step still holds all S rows,
    # so extremely long sequences could exceed the VMEM budget.

    # Give v7x's two TensorCores work (>=2 grid steps) when the batch is big
    # enough that the ~0.35 us/step overhead is irrelevant.
    if B > 1 and B * S >= 512:
        bt = min(bt, pl.cdiv(B, 2))

    n_blocks = pl.cdiv(B, bt)
    B_pad = n_blocks * bt
    if B_pad != B:
        # cdiv grid for awkward B: pad batch with zero rows, sliced off below.
        x = jnp.pad(x, ((0, B_pad - B), (0, 0), (0, 0)))

    out = pl.pallas_call(
        text_cond_kernel,
        out_shape=jax.ShapeDtypeStruct((B_pad, S, D), text_cond.dtype),
        grid_spec=pltpu.PrefetchScalarGridSpec(
            num_scalar_prefetch=0,
            grid=(n_blocks,),
            in_specs=[
                pl.BlockSpec(memory_space=pltpu.MemorySpace.SMEM),          # alpha/beta
                pl.BlockSpec((bt, S, D), lambda b: (b, 0, 0)),              # x (real width)
                pl.BlockSpec((NUM_MATS, D, D), lambda b: (0, 0, 0)),        # bf16 weight slab
                pl.BlockSpec((NUM_VECS, D), lambda b: (0, 0)),              # bias/LN slab
            ],
            out_specs=pl.BlockSpec((bt, S, D), lambda b: (b, 0, 0)),
        ),
        compiler_params=pltpu.CompilerParams(
            dimension_semantics=("parallel",),
            vmem_limit_bytes=32 * 1024 * 1024,
        ),
    )(scalars, x, w_slab, vec_slab)

    if B_pad != B:
        out = out[:B]
    if orig_ndim == 2:
        out = out[:, 0, :]
    return out


def reference(text_cond, params):
    """Pure-JAX f32 reference (eval mode, dropout = identity)."""
    orig_ndim = text_cond.ndim
    x = text_cond if orig_ndim == 3 else text_cond[:, None, :]
    B, S, D = x.shape
    alpha = params["alpha"][0]
    beta = params["beta"][0]

    def lin(h, w, b):                       # PyTorch Linear: h @ W.T + b, W is [out, in]
        return jnp.einsum("bsi,oi->bso", h, w) + b.reshape(-1)

    q = lin(x, params["wq"], params["bq"]).reshape(B, S, NUM_HEADS, HEAD_DIM)
    k = lin(x, params["wk"], params["bk"]).reshape(B, S, NUM_HEADS, HEAD_DIM)
    v = lin(x, params["wv"], params["bv"]).reshape(B, S, NUM_HEADS, HEAD_DIM)
    scores = jnp.einsum("bqhd,bkhd->bhqk", q, k) * ATTN_SCALE
    p = jax.nn.softmax(scores, axis=-1)
    ctx = jnp.einsum("bhqk,bkhd->bqhd", p, v).reshape(B, S, D)
    attended = x + beta * lin(ctx, params["wo"], params["bo"])

    def ln(h, g, b):
        mu = jnp.mean(h, axis=-1, keepdims=True)
        var = jnp.mean((h - mu) ** 2, axis=-1, keepdims=True)
        return (h - mu) * jax.lax.rsqrt(var + LN_EPS) * g.reshape(-1) + b.reshape(-1)

    h0 = ln(attended, params["ln1_g"], params["ln1_b"])
    h1 = lin(h0, params["w1"], params["b1"])
    h1 = 0.5 * h1 * (1.0 + jax.lax.erf(h1 / math.sqrt(2.0)))
    h2 = lin(h1, params["w2"], params["b2"])
    enhanced = ln(h2, params["ln2_g"], params["ln2_b"])
    out = jnp.tanh(lin(x + alpha * enhanced + beta * attended,
                       params["wout"], params["bout"]))
    if orig_ndim == 2:
        out = out[:, 0, :]
    return out


if __name__ == "__main__":
    key = jax.random.PRNGKey(0)
    k_param, k_x = jax.random.split(key)
    params = init_params(k_param)
    packed = pack_params(params)

    B, S, D = 2, 8, EMBED_DIM
    text_cond = jax.random.normal(k_x, (B, S, D), dtype=jnp.float32)

    out = jax.block_until_ready(text_cond_processor(text_cond, packed))
    assert out.shape == (B, S, D)
    assert jnp.all(jnp.isfinite(out))

    ref = reference(text_cond, params)
    err = float(jnp.max(jnp.abs(out - ref)))
    assert err < 1e-2, f"mismatch vs reference: {err}"

    # Also exercise the 2-D input path ([B, D] -> unsqueeze/squeeze).
    out2 = jax.block_until_ready(text_cond_processor(text_cond[:, 0, :], packed))
    assert out2.shape == (B, D)
    assert jnp.all(jnp.isfinite(out2))

    print("KERNEL_OK")
</pallas_src>

<mosaic_0001>
module attributes {stable_mosaic.version = 11 : i64} {
  func.func @text_cond_kernel(%arg0: i32, %arg1: memref<2xf32, #tpu.memory_space<smem>>, %arg2: memref<2x8x64xf32, #tpu.memory_space<vmem>>, %arg3: memref<7x64x64xbf16, #tpu.memory_space<vmem>>, %arg4: memref<11x64xf32, #tpu.memory_space<vmem>>, %arg5: memref<2x8x64xf32, #tpu.memory_space<vmem>>) attributes {dimension_semantics = [#tpu.dimension_semantics<parallel>], iteration_bounds = array<i64: 1>, scalar_prefetch = 0 : i64, scratch_operands = 0 : i64, tpu.core_type = #tpu.core_type<tc>, window_params = [{transform_indices = @transform_0, window_bounds = array<i64: 2>}, {transform_indices = @transform_1, window_bounds = array<i64: 2, 8, 64>}, {pipeline_mode = #tpu.pipeline_mode<synchronous>, transform_indices = @transform_2, window_bounds = array<i64: 7, 64, 64>}, {pipeline_mode = #tpu.pipeline_mode<synchronous>, transform_indices = @transform_3, window_bounds = array<i64: 11, 64>}, {transform_indices = @transform_4, window_bounds = array<i64: 2, 8, 64>}]} {
    %c0 = arith.constant 0 : index
    %0 = memref.load %arg1[%c0] : memref<2xf32, #tpu.memory_space<smem>>
    %c1 = arith.constant 1 : index
    %1 = memref.load %arg1[%c1] : memref<2xf32, #tpu.memory_space<smem>>
    %c0_0 = arith.constant 0 : index
    %c0_1 = arith.constant 0 : index
    %c0_2 = arith.constant 0 : index
    %2 = vector.load %arg2[%c0_0, %c0_1, %c0_2] : memref<2x8x64xf32, #tpu.memory_space<vmem>>, vector<2x8x64xf32>
    %3 = vector.shape_cast %2 : vector<2x8x64xf32> to vector<16x64xf32>
    %4 = arith.truncf %3 : vector<16x64xf32> to vector<16x64xbf16>
    %c0_3 = arith.constant 0 : index
    %c0_4 = arith.constant 0 : index
    %5 = vector.load %arg4[%c0_3, %c0_4] : memref<11x64xf32, #tpu.memory_space<vmem>>, vector<11x64xf32>
    %c0_5 = arith.constant 0 : index
    %c0_6 = arith.constant 0 : index
    %c0_7 = arith.constant 0 : index
    %6 = vector.load %arg3[%c0_5, %c0_6, %c0_7] : memref<7x64x64xbf16, #tpu.memory_space<vmem>>, vector<1x64x64xbf16>
    %7 = vector.shape_cast %6 : vector<1x64x64xbf16> to vector<64x64xbf16>
    %cst = arith.constant dense<0.000000e+00> : vector<16x64xf32>
    %8 = tpu.matmul %4, %7, %cst {dimension_numbers = #tpu.dot_dimension_numbers<[1], [0], [0], [1], [0, 0, 1, 1], [], []>} : vector<16x64xbf16>, vector<64x64xbf16>, vector<16x64xf32> -> vector<16x64xf32>
    %9 = vector.extract_strided_slice %5 {offsets = [0, 0], sizes = [1, 64], strides = [1, 1]} : vector<11x64xf32> to vector<1x64xf32>
    %10 = vector.broadcast %9 : vector<1x64xf32> to vector<16x64xf32>
    %11 = arith.addf %8, %10 : vector<16x64xf32>
    %12 = vector.shape_cast %11 : vector<16x64xf32> to vector<2x8x8x8xf32>
    %13 = tpu.transpose %12, [0, 2, 1, 3] : vector<2x8x8x8xf32> -> vector<2x8x8x8xf32>
    %14 = vector.shape_cast %13 : vector<2x8x8x8xf32> to vector<16x8x8xf32>
    %c1_8 = arith.constant 1 : index
    %c0_9 = arith.constant 0 : index
    %c0_10 = arith.constant 0 : index
    %15 = vector.load %arg3[%c1_8, %c0_9, %c0_10] : memref<7x64x64xbf16, #tpu.memory_space<vmem>>, vector<1x64x64xbf16>
    %16 = vector.shape_cast %15 : vector<1x64x64xbf16> to vector<64x64xbf16>
    %cst_11 = arith.constant dense<0.000000e+00> : vector<16x64xf32>
    %17 = tpu.matmul %4, %16, %cst_11 {dimension_numbers = #tpu.dot_dimension_numbers<[1], [0], [0], [1], [0, 0, 1, 1], [], []>} : vector<16x64xbf16>, vector<64x64xbf16>, vector<16x64xf32> -> vector<16x64xf32>
    %18 = vector.extract_strided_slice %5 {offsets = [1, 0], sizes = [1, 64], strides = [1, 1]} : vector<11x64xf32> to vector<1x64xf32>
    %19 = vector.broadcast %18 : vector<1x64xf32> to vector<16x64xf32>
    %20 = arith.addf %17, %19 : vector<16x64xf32>
    %21 = vector.shape_cast %20 : vector<16x64xf32> to vector<2x8x8x8xf32>
    %22 = tpu.transpose %21, [0, 2, 1, 3] : vector<2x8x8x8xf32> -> vector<2x8x8x8xf32>
    %23 = vector.shape_cast %22 : vector<2x8x8x8xf32> to vector<16x8x8xf32>
    %c2 = arith.constant 2 : index
    %c0_12 = arith.constant 0 : index
    %c0_13 = arith.constant 0 : index
    %24 = vector.load %arg3[%c2, %c0_12, %c0_13] : memref<7x64x64xbf16, #tpu.memory_space<vmem>>, vector<1x64x64xbf16>
    %25 = vector.shape_cast %24 : vector<1x64x64xbf16> to vector<64x64xbf16>
    %cst_14 = arith.constant dense<0.000000e+00> : vector<16x64xf32>
    %26 = tpu.matmul %4, %25, %cst_14 {dimension_numbers = #tpu.dot_dimension_numbers<[1], [0], [0], [1], [0, 0, 1, 1], [], []>} : vector<16x64xbf16>, vector<64x64xbf16>, vector<16x64xf32> -> vector<16x64xf32>
    %27 = vector.extract_strided_slice %5 {offsets = [2, 0], sizes = [1, 64], strides = [1, 1]} : vector<11x64xf32> to vector<1x64xf32>
    %28 = vector.broadcast %27 : vector<1x64xf32> to vector<16x64xf32>
    %29 = arith.addf %26, %28 : vector<16x64xf32>
    %30 = vector.shape_cast %29 : vector<16x64xf32> to vector<2x8x8x8xf32>
    %31 = tpu.transpose %30, [0, 2, 1, 3] : vector<2x8x8x8xf32> -> vector<2x8x8x8xf32>
    %32 = vector.shape_cast %31 : vector<2x8x8x8xf32> to vector<16x8x8xf32>
    "tpu.trace_start"() <{level = 10 : i32, message = "nqd,nkd->nqk"}> : () -> ()
    %cst_15 = arith.constant dense<0.000000e+00> : vector<16x8x8xf32>
    %33 = tpu.matmul %14, %23, %cst_15 {dimension_numbers = #tpu.dot_dimension_numbers<[2], [2], [1], [1], [0, 0, 0, 1, 1, 1], [0], [0]>} : vector<16x8x8xf32>, vector<16x8x8xf32>, vector<16x8x8xf32> -> vector<16x8x8xf32>
    "tpu.trace_stop"() : () -> ()
    %cst_16 = arith.constant 0.353553385 : f32
    %34 = vector.broadcast %cst_16 : f32 to vector<16x8x8xf32>
    %35 = arith.mulf %33, %34 : vector<16x8x8xf32>
    %cst_17 = arith.constant dense<0xFF800000> : vector<16x8xf32>
    %36 = vector.multi_reduction <maximumf>, %35, %cst_17 [2] : vector<16x8x8xf32> to vector<16x8xf32>
    %37 = vector.shape_cast %36 : vector<16x8xf32> to vector<16x8x1xf32>
    %38 = vector.broadcast %37 : vector<16x8x1xf32> to vector<16x8x8xf32>
    %39 = arith.subf %35, %38 : vector<16x8x8xf32>
    %40 = math.exp %39 : vector<16x8x8xf32>
    %cst_18 = arith.constant dense<0.000000e+00> : vector<16x8xf32>
    %41 = vector.multi_reduction <add>, %40, %cst_18 [2] : vector<16x8x8xf32> to vector<16x8xf32>
    %42 = vector.shape_cast %41 : vector<16x8xf32> to vector<16x8x1xf32>
    %43 = tpu.reciprocal %42 {approx = true} : vector<16x8x1xf32> -> vector<16x8x1xf32>
    %44 = vector.broadcast %43 : vector<16x8x1xf32> to vector<16x8x8xf32>
    %45 = arith.mulf %40, %44 : vector<16x8x8xf32>
    "tpu.trace_start"() <{level = 10 : i32, message = "nqk,nkd->nqd"}> : () -> ()
    %cst_19 = arith.constant dense<0.000000e+00> : vector<16x8x8xf32>
    %46 = tpu.matmul %45, %32, %cst_19 {dimension_numbers = #tpu.dot_dimension_numbers<[2], [1], [1], [2], [0, 0, 0, 1, 1, 2], [0], [0]>} : vector<16x8x8xf32>, vector<16x8x8xf32>, vector<16x8x8xf32> -> vector<16x8x8xf32>
    "tpu.trace_stop"() : () -> ()
    %47 = vector.shape_cast %46 : vector<16x8x8xf32> to vector<2x8x8x8xf32>
    %48 = tpu.transpose %47, [0, 2, 1, 3] : vector<2x8x8x8xf32> -> vector<2x8x8x8xf32>
    %49 = vector.shape_cast %48 : vector<2x8x8x8xf32> to vector<16x64xf32>
    %50 = arith.truncf %49 : vector<16x64xf32> to vector<16x64xbf16>
    %c3 = arith.constant 3 : index
    %c0_20 = arith.constant 0 : index
    %c0_21 = arith.constant 0 : index
    %51 = vector.load %arg3[%c3, %c0_20, %c0_21] : memref<7x64x64xbf16, #tpu.memory_space<vmem>>, vector<1x64x64xbf16>
    %52 = vector.shape_cast %51 : vector<1x64x64xbf16> to vector<64x64xbf16>
    %cst_22 = arith.constant dense<0.000000e+00> : vector<16x64xf32>
    %53 = tpu.matmul %50, %52, %cst_22 {dimension_numbers = #tpu.dot_dimension_numbers<[1], [0], [0], [1], [0, 0, 1, 1], [], []>} : vector<16x64xbf16>, vector<64x64xbf16>, vector<16x64xf32> -> vector<16x64xf32>
    %54 = vector.extract_strided_slice %5 {offsets = [3, 0], sizes = [1, 64], strides = [1, 1]} : vector<11x64xf32> to vector<1x64xf32>
    %55 = vector.broadcast %54 : vector<1x64xf32> to vector<16x64xf32>
    %56 = arith.addf %53, %55 : vector<16x64xf32>
    %57 = vector.broadcast %1 : f32 to vector<16x64xf32>
    %58 = arith.mulf %57, %56 : vector<16x64xf32>
    %59 = arith.addf %3, %58 : vector<16x64xf32>
    %60 = vector.extract_strided_slice %5 {offsets = [4, 0], sizes = [1, 64], strides = [1, 1]} : vector<11x64xf32> to vector<1x64xf32>
    %61 = vector.extract_strided_slice %5 {offsets = [5, 0], sizes = [1, 64], strides = [1, 1]} : vector<11x64xf32> to vector<1x64xf32>
    %cst_23 = arith.constant dense<0.000000e+00> : vector<16xf32>
    %62 = vector.multi_reduction <add>, %59, %cst_23 [1] : vector<16x64xf32> to vector<16xf32>
    %63 = vector.shape_cast %62 : vector<16xf32> to vector<16x1xf32>
    %cst_24 = arith.constant 1.562500e-02 : f32
    %64 = vector.broadcast %cst_24 : f32 to vector<16x1xf32>
    %65 = arith.mulf %63, %64 : vector<16x1xf32>
    %66 = vector.broadcast %65 : vector<16x1xf32> to vector<16x64xf32>
    %67 = arith.subf %59, %66 : vector<16x64xf32>
    %68 = arith.mulf %67, %67 : vector<16x64xf32>
    %cst_25 = arith.constant dense<0.000000e+00> : vector<16xf32>
    %69 = vector.multi_reduction <add>, %68, %cst_25 [1] : vector<16x64xf32> to vector<16xf32>
    %70 = vector.shape_cast %69 : vector<16xf32> to vector<16x1xf32>
    %cst_26 = arith.constant 1.562500e-02 : f32
    %71 = vector.broadcast %cst_26 : f32 to vector<16x1xf32>
    %72 = arith.mulf %70, %71 : vector<16x1xf32>
    %cst_27 = arith.constant 9.99999974E-6 : f32
    %73 = vector.broadcast %cst_27 : f32 to vector<16x1xf32>
    %74 = arith.addf %72, %73 : vector<16x1xf32>
    %75 = math.rsqrt %74 : vector<16x1xf32>
    %76 = vector.broadcast %75 : vector<16x1xf32> to vector<16x64xf32>
    %77 = arith.mulf %67, %76 : vector<16x64xf32>
    %78 = vector.broadcast %60 : vector<1x64xf32> to vector<16x64xf32>
    %79 = arith.mulf %77, %78 : vector<16x64xf32>
    %80 = vector.broadcast %61 : vector<1x64xf32> to vector<16x64xf32>
    %81 = arith.addf %79, %80 : vector<16x64xf32>
    %82 = arith.truncf %81 : vector<16x64xf32> to vector<16x64xbf16>
    %c4 = arith.constant 4 : index
    %c0_28 = arith.constant 0 : index
    %c0_29 = arith.constant 0 : index
    %83 = vector.load %arg3[%c4, %c0_28, %c0_29] : memref<7x64x64xbf16, #tpu.memory_space<vmem>>, vector<1x64x64xbf16>
    %84 = vector.shape_cast %83 : vector<1x64x64xbf16> to vector<64x64xbf16>
    %cst_30 = arith.constant dense<0.000000e+00> : vector<16x64xf32>
    %85 = tpu.matmul %82, %84, %cst_30 {dimension_numbers = #tpu.dot_dimension_numbers<[1], [0], [0], [1], [0, 0, 1, 1], [], []>} : vector<16x64xbf16>, vector<64x64xbf16>, vector<16x64xf32> -> vector<16x64xf32>
    %86 = vector.extract_strided_slice %5 {offsets = [6, 0], sizes = [1, 64], strides = [1, 1]} : vector<11x64xf32> to vector<1x64xf32>
    %87 = vector.broadcast %86 : vector<1x64xf32> to vector<16x64xf32>
    %88 = arith.addf %85, %87 : vector<16x64xf32>
    %cst_31 = arith.constant 5.000000e-01 : f32
    %89 = vector.broadcast %cst_31 : f32 to vector<16x64xf32>
    %90 = arith.mulf %89, %88 : vector<16x64xf32>
    %cst_32 = arith.constant 0.707106769 : f32
    %91 = vector.broadcast %cst_32 : f32 to vector<16x64xf32>
    %92 = arith.mulf %88, %91 : vector<16x64xf32>
    %93 = math.erf %92 : vector<16x64xf32>
    %cst_33 = arith.constant 1.000000e+00 : f32
    %94 = vector.broadcast %cst_33 : f32 to vector<16x64xf32>
    %95 = arith.addf %94, %93 : vector<16x64xf32>
    %96 = arith.mulf %90, %95 : vector<16x64xf32>
    %97 = arith.truncf %96 : vector<16x64xf32> to vector<16x64xbf16>
    %c5 = arith.constant 5 : index
    %c0_34 = arith.constant 0 : index
    %c0_35 = arith.constant 0 : index
    %98 = vector.load %arg3[%c5, %c0_34, %c0_35] : memref<7x64x64xbf16, #tpu.memory_space<vmem>>, vector<1x64x64xbf16>
    %99 = vector.shape_cast %98 : vector<1x64x64xbf16> to vector<64x64xbf16>
    %cst_36 = arith.constant dense<0.000000e+00> : vector<16x64xf32>
    %100 = tpu.matmul %97, %99, %cst_36 {dimension_numbers = #tpu.dot_dimension_numbers<[1], [0], [0], [1], [0, 0, 1, 1], [], []>} : vector<16x64xbf16>, vector<64x64xbf16>, vector<16x64xf32> -> vector<16x64xf32>
    %101 = vector.extract_strided_slice %5 {offsets = [7, 0], sizes = [1, 64], strides = [1, 1]} : vector<11x64xf32> to vector<1x64xf32>
    %102 = vector.broadcast %101 : vector<1x64xf32> to vector<16x64xf32>
    %103 = arith.addf %100, %102 : vector<16x64xf32>
    %104 = vector.extract_strided_slice %5 {offsets = [8, 0], sizes = [1, 64], strides = [1, 1]} : vector<11x64xf32> to vector<1x64xf32>
    %105 = vector.extract_strided_slice %5 {offsets = [9, 0], sizes = [1, 64], strides = [1, 1]} : vector<11x64xf32> to vector<1x64xf32>
    %cst_37 = arith.constant dense<0.000000e+00> : vector<16xf32>
    %106 = vector.multi_reduction <add>, %103, %cst_37 [1] : vector<16x64xf32> to vector<16xf32>
    %107 = vector.shape_cast %106 : vector<16xf32> to vector<16x1xf32>
    %cst_38 = arith.constant 1.562500e-02 : f32
    %108 = vector.broadcast %cst_38 : f32 to vector<16x1xf32>
    %109 = arith.mulf %107, %108 : vector<16x1xf32>
    %110 = vector.broadcast %109 : vector<16x1xf32> to vector<16x64xf32>
    %111 = arith.subf %103, %110 : vector<16x64xf32>
    %112 = arith.mulf %111, %111 : vector<16x64xf32>
    %cst_39 = arith.constant dense<0.000000e+00> : vector<16xf32>
    %113 = vector.multi_reduction <add>, %112, %cst_39 [1] : vector<16x64xf32> to vector<16xf32>
    %114 = vector.shape_cast %113 : vector<16xf32> to vector<16x1xf32>
    %cst_40 = arith.constant 1.562500e-02 : f32
    %115 = vector.broadcast %cst_40 : f32 to vector<16x1xf32>
    %116 = arith.mulf %114, %115 : vector<16x1xf32>
    %cst_41 = arith.constant 9.99999974E-6 : f32
    %117 = vector.broadcast %cst_41 : f32 to vector<16x1xf32>
    %118 = arith.addf %116, %117 : vector<16x1xf32>
    %119 = math.rsqrt %118 : vector<16x1xf32>
    %120 = vector.broadcast %119 : vector<16x1xf32> to vector<16x64xf32>
    %121 = arith.mulf %111, %120 : vector<16x64xf32>
    %122 = vector.broadcast %104 : vector<1x64xf32> to vector<16x64xf32>
    %123 = arith.mulf %121, %122 : vector<16x64xf32>
    %124 = vector.broadcast %105 : vector<1x64xf32> to vector<16x64xf32>
    %125 = arith.addf %123, %124 : vector<16x64xf32>
    %126 = vector.broadcast %0 : f32 to vector<16x64xf32>
    %127 = arith.mulf %126, %125 : vector<16x64xf32>
    %128 = arith.addf %3, %127 : vector<16x64xf32>
    %129 = vector.broadcast %1 : f32 to vector<16x64xf32>
    %130 = arith.mulf %129, %59 : vector<16x64xf32>
    %131 = arith.addf %128, %130 : vector<16x64xf32>
    %132 = arith.truncf %131 : vector<16x64xf32> to vector<16x64xbf16>
    %c6 = arith.constant 6 : index
    %c0_42 = arith.constant 0 : index
    %c0_43 = arith.constant 0 : index
    %133 = vector.load %arg3[%c6, %c0_42, %c0_43] : memref<7x64x64xbf16, #tpu.memory_space<vmem>>, vector<1x64x64xbf16>
    %134 = vector.shape_cast %133 : vector<1x64x64xbf16> to vector<64x64xbf16>
    %cst_44 = arith.constant dense<0.000000e+00> : vector<16x64xf32>
    %135 = tpu.matmul %132, %134, %cst_44 {dimension_numbers = #tpu.dot_dimension_numbers<[1], [0], [0], [1], [0, 0, 1, 1], [], []>} : vector<16x64xbf16>, vector<64x64xbf16>, vector<16x64xf32> -> vector<16x64xf32>
    %136 = vector.extract_strided_slice %5 {offsets = [10, 0], sizes = [1, 64], strides = [1, 1]} : vector<11x64xf32> to vector<1x64xf32>
    %137 = vector.broadcast %136 : vector<1x64xf32> to vector<16x64xf32>
    %138 = arith.addf %135, %137 : vector<16x64xf32>
    %139 = math.tanh %138 : vector<16x64xf32>
    %140 = vector.shape_cast %139 : vector<16x64xf32> to vector<2x8x64xf32>
    %c0_45 = arith.constant 0 : index
    %c0_46 = arith.constant 0 : index
    %c0_47 = arith.constant 0 : index
    %141 = vector.load %arg5[%c0_45, %c0_46, %c0_47] : memref<2x8x64xf32, #tpu.memory_space<vmem>>, vector<2x8x64xf32>
    tpu.vector_store %arg5[%c0_45, %c0_46, %c0_47], %140 {strides = array<i32>} : memref<2x8x64xf32, #tpu.memory_space<vmem>>, vector<2x8x64xf32>,
    return
  }
  func.func @transform_0(%arg0: i32) -> i32 {
    %c0_i32 = arith.constant 0 : i32
    %c0_i32_0 = arith.constant 0 : i32
    return %c0_i32 : i32
  }
  func.func @transform_1(%arg0: i32) -> (i32, i32, i32) {
    %c0_i32 = arith.constant 0 : i32
    %c0_i32_0 = arith.constant 0 : i32
    %c0_i32_1 = arith.constant 0 : i32
    return %arg0, %c0_i32, %c0_i32_0 : i32, i32, i32
  }
  func.func @transform_2(%arg0: i32) -> (i32, i32, i32) {
    %c0_i32 = arith.constant 0 : i32
    %c0_i32_0 = arith.constant 0 : i32
    %c0_i32_1 = arith.constant 0 : i32
    %c0_i32_2 = arith.constant 0 : i32
    return %c0_i32, %c0_i32_0, %c0_i32_1 : i32, i32, i32
  }
  func.func @transform_3(%arg0: i32) -> (i32, i32) {
    %c0_i32 = arith.constant 0 : i32
    %c0_i32_0 = arith.constant 0 : i32
    %c0_i32_1 = arith.constant 0 : i32
    return %c0_i32, %c0_i32_0 : i32, i32
  }
  func.func @transform_4(%arg0: i32) -> (i32, i32, i32) {
    %c0_i32 = arith.constant 0 : i32
    %c0_i32_0 = arith.constant 0 : i32
    %c0_i32_1 = arith.constant 0 : i32
    return %arg0, %c0_i32, %c0_i32_0 : i32, i32, i32
  }
}

</mosaic_0001>

<bundles_post_ra>
// kernel: tpu_custom_call.1
= control target key start
LH: loop header
LB: loop body
LE: loop exit
PB: predicated region body
PF: predicated region fallthrough
CT: control target
= control target key end

     0   :  { %9 = vsyncpa [#allocation5], 0  ;;  %s7645_s0 = inlined_call_operand.hbm [shape: f32[2], index: 0, kind: input, shape index: {}]   ;;  %s7646_s1 = inlined_call_operand.hbm [shape: f32[2,8,64], index: 1, kind: input, shape index: {}]   ;;  %s7647_s2 = inlined_call_operand.hbm [shape: bf16[7,64,64], index: 2, kind: input, shape index: {}]   ;;  %s7648_s3 = inlined_call_operand.hbm [shape: f32[11,64], index: 3, kind: input, shape index: {}]   ;;  %s7649_s4 = inlined_call_operand.hbm [shape: f32[2,8,64], index: 4, kind: output, shape index: {}]  }
   0x1   :  { %10 = vsyncpa [#allocation3], 0 }
   0x2   :  { %11 = vsyncpa [#allocation8], 0 }
   0x3   :  { %12 = vsyncpa [#allocation4], 0  ;;  %s6486_s15 = smov [#allocation7]  }
   0x4   :  { %s38_s16 = sshll.u32 %s6486_s15, 4  ;;  %s39_s16 = int_to_ptr.vmem [resolvable:$true] %s38_s16 }
   0x5   :  { %s6398_s17 = scalar_lea.vmem %s39_s16, 3584  ;;  %p6403_p1 = scmp.lt.s32.totalorder %s39_s16, %s39_s16 }
   0x6   :  { %p6399_p0 = scmp.ne.s32.totalorder %s39_s16, %s6398_s17  ;;  %p6404_p2 = scmp.lt.s32.totalorder %s6398_s17, %s6398_s17 }
   0x8   :  { %p6405_p3 = por %p6404_p2, %p6403_p1 }
   0xa   :  { %p6406_p4 = pnand %p6405_p3, %p6399_p0 }
   0xc   :  { %6409 = shalt.err (!%p6406_p4)
}
   0xd   :  { %s6487_s18 = smov 64   ;;  %s6488_s19 = smov 4  }
   0xe   :  { %44 = dma.hbm_to_vmem [thread:$0]  %s7647_s2, 3584, %s39_s16, [#allocation8], %s6487_s18, %s6487_s18, %s6488_s19  }
   0xf   :  { %s6489_s22 = smov [#allocation2]   ;;  %s6490_s25 = smov [#allocation6]  }
  0x10   :  { %20 = dma.hbm_to_smem %s7645_s0, 16, %s6489_s22, [#allocation5]  }
  0x11   :  { %s26_s26 = sshll.u32 %s6490_s25, 4  ;;  %s27_s26 = int_to_ptr.vmem [resolvable:$true] %s26_s26 }
  0x12   :  { %s6426_s27 = scalar_lea.vmem %s27_s26, 256  ;;  %p6431_p6 = scmp.lt.s32.totalorder %s27_s26, %s27_s26 }
  0x13   :  { %p6427_p5 = scmp.ne.s32.totalorder %s27_s26, %s6426_s27  ;;  %p6432_p7 = scmp.lt.s32.totalorder %s6426_s27, %s6426_s27 }
  0x15   :  { %p6433_p8 = por %p6432_p7, %p6431_p6 }
  0x17   :  { %p6434_p9 = pnand %p6433_p8, %p6427_p5 }
  0x19   :  { %6437 = shalt.err (!%p6434_p9)
}
  0x1a   :  { %s6491_s28 = smov 128   ;;  %s6492_s29 = smov 8  }
  0x1b   :  { %32 = dma.hbm_to_vmem [thread:$0]  %s7646_s1, 256, %s27_s26, [#allocation3], %s6491_s28, %s6491_s28, %s6492_s29  }
  0x1c   :  { %s6493_s0 = smov [#allocation9]  }
  0x1d   :  { %s50_s5 = sshll.u32 %s6493_s0, 4  ;;  %s51_s5 = int_to_ptr.vmem [resolvable:$true] %s50_s5 }
  0x1e   :  { %s6446_s6 = scalar_lea.vmem %s51_s5, 256  ;;  %p6451_p11 = scmp.lt.s32.totalorder %s51_s5, %s51_s5 }
  0x1f   :  { %p6447_p10 = scmp.ne.s32.totalorder %s51_s5, %s6446_s6  ;;  %p6452_p12 = scmp.lt.s32.totalorder %s6446_s6, %s6446_s6 }
  0x21   :  { %p6453_p13 = por %p6452_p12, %p6451_p11 }
  0x23   :  { %p6454_p0 = pnand %p6453_p13, %p6447_p10 }
  0x25   :  { %6457 = shalt.err (!%p6454_p0)
}
  0x26   :  { %56 = dma.hbm_to_vmem [thread:$0]  %s7648_s3, 256, %s51_s5, [#allocation8], %s6491_s28, %s6491_s28, %s6492_s29  }
  0x27   :  { %6478 = dma.done.wait [#allocation5], 16  }
  0x28   :  { %6479 = vsyncadd [#allocation5], 4294967280 }
  0x29   :  { %6480 = dma.done.wait [#allocation3], 256  }
  0x2a   :  { %6481 = vsyncadd [#allocation3], 4294967040 }
  0x2b   :  { %6482 = dma.done.wait [#allocation8], 3840  }
  0x2c   :  { %6483 = vsyncadd [#allocation8], 4294963456 }
  0x2d   :  { %69 = sfence }
  0x2e   :  { %v6279_v0 = vld [vmem:[#allocation7 + $0x18] sm:$0xff]   ;;  %v6494_v1 = vmov 0.0   ;;  %v6281_v3 = vld [vmem:[#allocation7 + $0x10] sm:$0xff]   ;;  %vm6495_vm0 = vmmov 0   ;;  %v6283_v5 = vld [vmem:[#allocation7 + $0x8] sm:$0xff]   ;;  %vm114_vm1 = vcmask 523264   ;;  %v86_v16 = vlaneseq }
  0x2f   :  { %5974 = vmatprep.subr.bf16.mxu0 %v6494_v1  ;;  %5986 = vmatprep.subr.bf16.mxu1 %v6494_v1  ;;  %v6280_v2 = vld [vmem:[#allocation7 + $0x38] sm:$0xff]   ;;  %v6282_v4 = vld [vmem:[#allocation7 + $0x30] sm:$0xff]   ;;  %v6284_v6 = vld [vmem:[#allocation7 + $0x28] sm:$0xff]   ;;  %s6496_s1 = smov 104   ;;  %s6497_s3 = smov 120   ;;  %vm2079_vm2 = vcmask 64512  }
  0x30   :  { %5975 = vmatpush3.bf16.msra.mxu0 %v6279_v0  ;;  %5982 = vmatprep.mubr.msk.bf16.mxu0 %vm6495_vm0, %v6494_v1  ;;  %v6285_v7 = vld [vmem:[#allocation7] sm:$0xff]   ;;  %v73_v8 = vld [vmem:[#allocation6] sm:$0xff]  ;;  %v74_v9 = vld [vmem:[#allocation6 + $0x8] sm:$0xff]  ;;  %v6582_v17 = vshrl.u32 %v86_v16, 7  ;;  %s6498_s9 = smov 112   ;;  %s6499_s10 = smov 96  }
  0x31   :  { %5987 = vmatpush3.bf16.msra.mxu1 %v6280_v2  ;;  %5976 = vmatprep.subr.bf16.mxu0 %v6494_v1  ;;  %v6286_v10 = vld [vmem:[#allocation7 + $0x20] sm:$0xff]   ;;  %v75_v11 = vpack.c.bf16 %v74_v9, %v73_v8  ;;  %v6287_v12 = vld [vmem:[#allocation7 + $0x58] sm:$0xff]   ;;  %v6288_v13 = vld [vmem:[#allocation7 + $0x50] sm:$0xff]   ;;  %s6500_s11 = smov 88   ;;  %s6501_s12 = smov 80   ;;  %vm5258_vm3 = vcmask 130048  }
  0x32   :  { %5988 = vmatprep.subr.bf16.mxu1 %v6494_v1  ;;  %5994 = vmatprep.mubr.msk.bf16.mxu1 %vm6495_vm0, %v6494_v1  ;;  %v6289_v14 = vld [vmem:[#allocation7 + $0x48] sm:$0xff]   ;;  %v6290_v15 = vld [vmem:[#allocation7 + $0x40] sm:$0xff]   ;;  %v758_v18 = vsub.s32 1, %v6582_v17  ;;  %v88_v20 = vsub.s32 0, %v6582_v17  ;;  %s6502_s13 = smov 72   ;;  %v1424_v35 = vsub.s32 2, %v6582_v17 }
  0x33   :  { %v76_v19 = vld [vmem:[#allocation9] sm:$0xff]  ;;  %v6503_v43 = vmov 1983009808   ;;  %v6504_v45 = vmov 1934713408   ;;  %s6505_s14 = smov 16  }
  0x34   :  { %5977 = vmatpush3.bf16.msra.mxu0 %v6281_v3  ;;  %v759_v21 = vrot.slane %v76_v19, %v758_v18  ;;  %v89_v22 = vrot.slane %v76_v19, %v88_v20  ;;  %v1425_v36 = vrot.slane %v76_v19, %v1424_v35  ;;  %v206_v44 = vunpack.c.l.s4 %v6503_v43  ;;  %s6506_s15 = smov 24   ;;  %s6507_s16 = smov 40  }
  0x35   :  { %5989 = vmatpush3.bf16.msra.mxu1 %v6282_v4  ;;  %5978 = vmatprep.subr.bf16.mxu0 %v6494_v1  ;;  %v270_v46 = vunpack.c.l.s4 %v6504_v45  ;;  %s6508_s17 = smov 32   ;;  %s6509_s18 = smov 56   ;;  %vm5261_vm4 = vcmask 195584   ;;  %vm5264_vm5 = vcmask 261120   ;;  %vm5267_vm6 = vcmask 326656  }
  0x36   :  { %5990 = vmatprep.subr.bf16.mxu1 %v6494_v1  ;;  %v207_v47 = vunpack.c.0.s8 %v206_v44  ;;  %s6510_s19 = smov 48   ;;  %vm5270_vm7 = vcmask 392192   ;;  %vm5273_vm8 = vcmask 457728   ;;  %s5727_s20 = sld [smem:[#allocation2 + $0x1]] }
  0x37   :  { %v271_v50 = vunpack.c.0.s8 %v270_v46  ;;  %s71_s21 = sld [smem:[#allocation2]]  ;;  %s6511_s22 = smov [#allocation10]  }
  0x38   :  { %5979 = vmatpush3.bf16.msra.mxu0 %v6283_v5  ;;  %v6682_v51 = vsub.s32 %v207_v47, %v6582_v17  ;;  %s5713_s23 = sshll.u32 %s6511_s22, 4  ;;  %s5714_s23 = int_to_ptr.vmem [resolvable:$true] %s5713_s23 }
  0x39   :  { %5991 = vmatpush3.bf16.msra.mxu1 %v6284_v6  ;;  %5980 = vmatprep.subr.bf16.mxu0 %v6494_v1  ;;  %v6687_v58 = vsub.s32 %v271_v50, %v6582_v17  ;;  %s6458_s24 = scalar_lea.vmem %s5714_s23, 256  ;;  %p6463_p2 = scmp.lt.s32.totalorder %s5714_s23, %s5714_s23 }
  0x3a   :  { %5992 = vmatprep.subr.bf16.mxu1 %v6494_v1  ;;  %p6459_p1 = scmp.ne.s32.totalorder %s5714_s23, %s6458_s24  ;;  %p6464_p3 = scmp.lt.s32.totalorder %s6458_s24, %s6458_s24 }
  0x3c   :  { %5981 = vmatpush3.bf16.msra.mxu0 %v6285_v7  ;;  %p6465_p4 = por %p6464_p3, %p6463_p2 }
  0x3d   :  { %5993 = vmatpush3.bf16.msra.mxu1 %v6286_v10  ;;  %5998 = vmatprep.subr.bf16.mxu0 %v6494_v1 }
  0x3e   :  { %6010 = vmatprep.subr.mxu1 %v6494_v1  ;;  %p6466_p5 = pnand %p6465_p4, %p6459_p1 }
  0x3f   :  { %5983 = vmatmul.mubr.msk.bf16.vlgmr.msra.gmra.mxu0 %vm114_vm1, %v75_v11 }
  0x40   :  { %5995 = vmatmul.mubr.msk.bf16.vlgmr.msra.gmra.mxu1 %vm114_vm1, %v75_v11  ;;  %5999 = vmatpush3.bf16.msra.mxu0 %v6287_v12 }
  0x41   :  { %6000 = vmatprep.subr.bf16.mxu0 %v6494_v1  ;;  %6006 = vmatprep.mubr.msk.bf16.mxu0 %vm6495_vm0, %v6494_v1 }
  0x42   :  { %6012 = vmatprep.mubr.msk.f32.mxu1 %vm6495_vm0, %v6494_v1 }
  0x44   :  { %6001 = vmatpush3.bf16.msra.mxu0 %v6288_v13 }
  0x45   :  { %6002 = vmatprep.subr.bf16.mxu0 %v6494_v1 }
  0x48   :  { %6003 = vmatpush3.bf16.msra.mxu0 %v6289_v14 }
  0x49   :  { %6004 = vmatprep.subr.bf16.mxu0 %v6494_v1 }
  0x4c   :  { %6005 = vmatpush3.bf16.msra.mxu0 %v6290_v15 }
  0x4d   :  { %6030 = vmatprep.subr.mxu0 %v6494_v1 }
  0x4f   :  { %6007 = vmatmul.mubr.msk.bf16.vlgmr.msra.gmra.mxu0 %vm114_vm1, %v75_v11 }
  0x50   :  { %6032 = vmatprep.mubr.msk.f32.mxu0 %vm6495_vm0, %v6494_v1 }
  0xff   :  { %v152_v23 = vpop.f32.mrf.mxu0 }
 0x100   :  { %v818_v24 = vpop.f32.mrf.mxu1  ;;  %v6592_v28 = vadd.f32 %v152_v23, %v89_v22 }
 0x101   :  { %v6590_v25 = vadd.f32 %v818_v24, %v759_v21  ;;  %v5984_v26 = vpop.f32.mrf.mxu0 }
 0x102   :  { %v5996_v27 = vpop.f32.mrf.mxu1 }
 0x103   :  { %839 = vrot.lane.b32.xlu1 %v6590_v25, %s6496_s1  ;;  %827 = vrot.lane.b32.xlu0 %v6590_v25, %s6497_s3  ;;  %v155_v29 = vpop.f32.mrf.mxu0 }
 0x104   :  { %v821_v30 = vpop.f32.mrf.mxu1  ;;  %v6628_v34 = vadd.f32 %v155_v29, %v89_v22 }
 0x105   :  { %v5985_v31 = vpop.f32.mrf.mxu0  ;;  %v6622_v33 = vadd.f32 %v821_v30, %v759_v21 }
 0x106   :  { %v5997_v32 = vpop.f32.mrf.mxu1 }
 0x107   :  { %833 = vrot.lane.b32.xlu0 %v6590_v25, %s6498_s9  ;;  %161 = vrot.lane.b32.xlu1 %v6592_v28, %s6497_s3 }
 0x10b   :  { %167 = vrot.lane.b32.xlu0 %v6592_v28, %s6498_s9  ;;  %173 = vrot.lane.b32.xlu1 %v6592_v28, %s6496_s1 }
 0x10f   :  { %845 = vrot.lane.b32.xlu0 %v6590_v25, %s6499_s10  ;;  %851 = vrot.lane.b32.xlu1 %v6590_v25, %s6500_s11  ;;  %v1484_v37 = vpop.f32.mrf.mxu0 }
 0x110   :  { %v6657_v38 = vadd.f32 %v1484_v37, %v1425_v36 }
 0x111   :  { %v6008_v39 = vpop.f32.mrf.mxu0 }
 0x113   :  { %857 = vrot.lane.b32.xlu0 %v6590_v25, %s6501_s12  ;;  %863 = vrot.lane.b32.xlu1 %v6590_v25, %s6502_s13  ;;  %v1487_v40 = vpop.f32.mrf.mxu0 }
 0x114   :  { %v6671_v42 = vadd.f32 %v1487_v40, %v1425_v36 }
 0x115   :  { %v6009_v41 = vpop.f32.mrf.mxu0 }
 0x117   :  { %179 = vrot.lane.b32.xlu0 %v6592_v28, %s6499_s10  ;;  %185 = vrot.lane.b32.xlu1 %v6592_v28, %s6500_s11 }
 0x11b   :  { %191 = vrot.lane.b32.xlu0 %v6592_v28, %s6501_s12  ;;  %197 = vrot.lane.b32.xlu1 %v6592_v28, %s6502_s13 }
 0x11f   :  { %829 = vrot.lane.b32.xlu0 %v6622_v33, %s6497_s3  ;;  %835 = vrot.lane.b32.xlu1 %v6622_v33, %s6498_s9 }
 0x123   :  { %841 = vrot.lane.b32.xlu0 %v6622_v33, %s6496_s1  ;;  %163 = vrot.lane.b32.xlu1 %v6628_v34, %s6497_s3 }
 0x127   :  { %169 = vrot.lane.b32.xlu0 %v6628_v34, %s6498_s9  ;;  %175 = vrot.lane.b32.xlu1 %v6628_v34, %s6496_s1 }
 0x12b   :  { %847 = vrot.lane.b32.xlu0 %v6622_v33, %s6499_s10  ;;  %853 = vrot.lane.b32.xlu1 %v6622_v33, %s6500_s11 }
 0x12f   :  { %859 = vrot.lane.b32.xlu0 %v6622_v33, %s6501_s12  ;;  %865 = vrot.lane.b32.xlu1 %v6622_v33, %s6502_s13 }
 0x133   :  { %181 = vrot.lane.b32.xlu0 %v6628_v34, %s6499_s10  ;;  %187 = vrot.lane.b32.xlu1 %v6628_v34, %s6500_s11 }
 0x137   :  { %193 = vrot.lane.b32.xlu0 %v6628_v34, %s6501_s12  ;;  %199 = vrot.lane.b32.xlu1 %v6628_v34, %s6502_s13 }
 0x13b   :  { %1493 = vrot.lane.b32.xlu1 %v6657_v38, %s6497_s3  ;;  %1499 = vrot.lane.b32.xlu0 %v6657_v38, %s6498_s9 }
 0x13f   :  { %1505 = vrot.lane.b32.xlu1 %v6657_v38, %s6496_s1  ;;  %1511 = vrot.lane.b32.xlu0 %v6657_v38, %s6499_s10 }
 0x143   :  { %1517 = vrot.lane.b32.xlu1 %v6657_v38, %s6500_s11  ;;  %1529 = vrot.lane.b32.xlu0 %v6657_v38, %s6502_s13 }
 0x147   :  { %1523 = vrot.lane.b32.xlu1 %v6657_v38, %s6501_s12  ;;  %1495 = vrot.lane.b32.xlu0 %v6671_v42, %s6497_s3 }
 0x14b   :  { %1501 = vrot.lane.b32.xlu1 %v6671_v42, %s6498_s9 }
 0x14f   :  { %1507 = vrot.lane.b32.xlu1 %v6671_v42, %s6496_s1 }
 0x175   :  { %v840_v48 = vpop.permute.xlu1 %839  ;;  %v828_v49 = vpop.permute.xlu0 %827 }
 0x176   :  { %v885_v52 = vcombine.low %v828_v49, %v840_v48  ;;  %v886_v53 = vcombine.high %v828_v49, %v840_v48 }
 0x178   :  { %v893_v59 = vrot.slane %v885_v52, %v6682_v51  ;;  %v900_v60 = vrot.slane %v886_v53, %v6682_v51 }
 0x179   :  { %v834_v54 = vpop.permute.xlu0 %833  ;;  %v162_v55 = vpop.permute.xlu1 %161 }
 0x17a   :  { %v869_v56 = vcombine.low %v6590_v25, %v834_v54  ;;  %v870_v57 = vcombine.high %v6590_v25, %v834_v54 }
 0x17c   :  { %v877_v61 = vrot.slane %v869_v56, %v6682_v51  ;;  %v884_v62 = vrot.slane %v870_v57, %v6682_v51 }
 0x17d   :  { %v168_v63 = vpop.permute.xlu0 %167  ;;  %v174_v0 = vpop.permute.xlu1 %173 }
 0x17e   :  { %v933_v2 = vcombine.low %v877_v61, %v893_v59  ;;  %v934_v3 = vcombine.high %v877_v61, %v893_v59  ;;  %v949_v4 = vcombine.low %v884_v62, %v900_v60  ;;  %v950_v5 = vcombine.high %v884_v62, %v900_v60 }
 0x17f   :  { %v203_v6 = vcombine.low %v6592_v28, %v168_v63  ;;  %v204_v7 = vcombine.high %v6592_v28, %v168_v63  ;;  %v219_v8 = vcombine.low %v162_v55, %v174_v0  ;;  %v220_v9 = vcombine.high %v162_v55, %v174_v0 }
 0x180   :  { %v941_v10 = vrot.slane %v933_v2, %v6687_v58  ;;  %v948_v11 = vrot.slane %v934_v3, %v6687_v58  ;;  %v957_v12 = vrot.slane %v949_v4, %v6687_v58  ;;  %v964_v13 = vrot.slane %v950_v5, %v6687_v58 }
 0x181   :  { %v211_v14 = vrot.slane %v203_v6, %v6682_v51  ;;  %v218_v15 = vrot.slane %v204_v7, %v6682_v51  ;;  %v227_v16 = vrot.slane %v219_v8, %v6682_v51  ;;  %v234_v19 = vrot.slane %v220_v9, %v6682_v51  ;;  %v846_v21 = vpop.permute.xlu0 %845  ;;  %v852_v22 = vpop.permute.xlu1 %851 }
 0x182   :  { %v5754_v23 = vcombine.low %v941_v10, %v948_v11  ;;  %v5756_v24 = vcombine.high %v941_v10, %v948_v11  ;;  %v5758_v25 = vcombine.low %v957_v12, %v964_v13  ;;  %v5760_v26 = vcombine.high %v957_v12, %v964_v13 }
 0x183   :  { %v267_v27 = vcombine.low %v211_v14, %v227_v16  ;;  %v268_v28 = vcombine.high %v211_v14, %v227_v16  ;;  %v283_v29 = vcombine.low %v218_v15, %v234_v19  ;;  %v284_v30 = vcombine.high %v218_v15, %v234_v19 }
 0x184   :  { %v6704_v31 = vrot.slane %v5754_v23, %v6682_v51  ;;  %v6707_v32 = vrot.slane %v5756_v24, %v6682_v51  ;;  %v6710_v36 = vrot.slane %v5758_v25, %v6682_v51  ;;  %v6713_v37 = vrot.slane %v5760_v26, %v6682_v51 }
 0x185   :  { %v275_v39 = vrot.slane %v267_v27, %v6687_v58  ;;  %v282_v40 = vrot.slane %v268_v28, %v6687_v58  ;;  %v291_v41 = vrot.slane %v283_v29, %v6687_v58  ;;  %v298_v43 = vrot.slane %v284_v30, %v6687_v58  ;;  %v858_v44 = vpop.permute.xlu0 %857  ;;  %v864_v45 = vpop.permute.xlu1 %863 }
 0x186   :  { %v1205_v46 = vcombine.low %v6704_v31, %v6707_v32  ;;  %v1206_v47 = vcombine.high %v6704_v31, %v6707_v32  ;;  %v1237_v48 = vcombine.low %v6710_v36, %v6713_v37  ;;  %v1238_v49 = vcombine.high %v6710_v36, %v6713_v37 }
 0x187   :  { %v5733_v50 = vcombine.low %v275_v39, %v282_v40  ;;  %v5735_v52 = vcombine.high %v275_v39, %v282_v40  ;;  %v5737_v53 = vcombine.low %v291_v41, %v298_v43  ;;  %v5739_v54 = vcombine.high %v291_v41, %v298_v43 }
 0x188   :  { %v901_v55 = vcombine.low %v846_v21, %v858_v44  ;;  %v902_v56 = vcombine.high %v846_v21, %v858_v44  ;;  %v917_v57 = vcombine.low %v852_v22, %v864_v45  ;;  %v918_v59 = vcombine.high %v852_v22, %v864_v45 }
 0x189   :  { %v6728_v60 = vrot.slane %v5733_v50, %v6682_v51  ;;  %v6731_v61 = vrot.slane %v5735_v52, %v6682_v51  ;;  %v6734_v62 = vrot.slane %v5737_v53, %v6682_v51  ;;  %v6737_v63 = vrot.slane %v5739_v54, %v6682_v51  ;;  %v180_v0 = vpop.permute.xlu0 %179  ;;  %v186_v2 = vpop.permute.xlu1 %185 }
 0x18a   :  { %v909_v3 = vrot.slane %v901_v55, %v6682_v51  ;;  %v916_v4 = vrot.slane %v902_v56, %v6682_v51  ;;  %v925_v5 = vrot.slane %v917_v57, %v6682_v51  ;;  %v932_v6 = vrot.slane %v918_v59, %v6682_v51 }
 0x18b   :  { %v539_v7 = vcombine.low %v6728_v60, %v6731_v61  ;;  %v540_v8 = vcombine.high %v6728_v60, %v6731_v61  ;;  %v571_v9 = vcombine.low %v6734_v62, %v6737_v63  ;;  %v572_v10 = vcombine.high %v6734_v62, %v6737_v63 }
 0x18c   :  { %v965_v11 = vcombine.low %v909_v3, %v925_v5  ;;  %v966_v12 = vcombine.high %v909_v3, %v925_v5  ;;  %v981_v13 = vcombine.low %v916_v4, %v932_v6  ;;  %v982_v14 = vcombine.high %v916_v4, %v932_v6 }
 0x18d   :  { %v1213_v15 = vrot.slane %v1205_v46, %v6687_v58  ;;  %v1245_v16 = vrot.slane %v1237_v48, %v6687_v58  ;;  %v192_v19 = vpop.permute.xlu0 %191  ;;  %v198_v21 = vpop.permute.xlu1 %197  ;;  %v6754_v22 = vrot.slane %v539_v7, %v6687_v58  ;;  %v6757_v23 = vrot.slane %v571_v9, %v6687_v58 }
 0x18e   :  { %v973_v24 = vrot.slane %v965_v11, %v6687_v58  ;;  %v980_v25 = vrot.slane %v966_v12, %v6687_v58  ;;  %v989_v26 = vrot.slane %v981_v13, %v6687_v58  ;;  %v996_v27 = vrot.slane %v982_v14, %v6687_v58 }
 0x18f   :  { %v1269_v28 = vcombine.low %v1213_v15, %v1245_v16  ;;  %v235_v29 = vcombine.low %v180_v0, %v192_v19  ;;  %v236_v30 = vcombine.high %v180_v0, %v192_v19  ;;  %v251_v39 = vcombine.low %v186_v2, %v198_v21 }
 0x190   :  { %v5755_v40 = vcombine.low %v973_v24, %v980_v25  ;;  %v5757_v41 = vcombine.high %v973_v24, %v980_v25  ;;  %v5759_v43 = vcombine.low %v989_v26, %v996_v27  ;;  %v5761_v44 = vcombine.high %v989_v26, %v996_v27 }
 0x191   :  { %6011 = vmatpush3.xpose.msk.msra.mxu1 %vm2079_vm2, %v1269_v28  ;;  %v243_v45 = vrot.slane %v235_v29, %v6682_v51  ;;  %v250_v46 = vrot.slane %v236_v30, %v6682_v51  ;;  %v252_v48 = vcombine.high %v186_v2, %v198_v21  ;;  %v259_v50 = vrot.slane %v251_v39, %v6682_v51  ;;  %v830_v52 = vpop.permute.xlu0 %829  ;;  %v836_v53 = vpop.permute.xlu1 %835 }
 0x192   :  { %v6768_v54 = vrot.slane %v5755_v40, %v6682_v51  ;;  %v6771_v55 = vrot.slane %v5757_v41, %v6682_v51  ;;  %v6774_v56 = vrot.slane %v5759_v43, %v6682_v51  ;;  %v6777_v57 = vrot.slane %v5761_v44, %v6682_v51  ;;  %6015 = vmatprep.subr.mxu1 %v6494_v1 }
 0x193   :  { %v266_v59 = vrot.slane %v252_v48, %v6682_v51  ;;  %v299_v0 = vcombine.low %v243_v45, %v259_v50  ;;  %v300_v2 = vcombine.high %v243_v45, %v259_v50  ;;  %v603_v3 = vcombine.low %v6754_v22, %v6757_v23 }
 0x194   :  { %v1221_v4 = vcombine.low %v6768_v54, %v6771_v55  ;;  %v1222_v5 = vcombine.high %v6768_v54, %v6771_v55  ;;  %v1253_v6 = vcombine.low %v6774_v56, %v6777_v57  ;;  %v1254_v7 = vcombine.high %v6774_v56, %v6777_v57 }
 0x195   :  { %v307_v9 = vrot.slane %v299_v0, %v6687_v58  ;;  %v314_v11 = vrot.slane %v300_v2, %v6687_v58  ;;  %v315_v12 = vcombine.low %v250_v46, %v266_v59  ;;  %v316_v13 = vcombine.high %v250_v46, %v266_v59  ;;  %6013 = vmatmul.mubr.msk.f32.vlgmr.msra.gmra.mxu1 %vm2079_vm2, %v603_v3  ;;  %v842_v14 = vpop.permute.xlu0 %841  ;;  %v6794_v19 = vpop.permute.xlu1 %163 }
 0x196   :  { %v1270_v21 = vcombine.high %v1213_v15, %v1245_v16  ;;  %v1005_v24 = vcombine.low %v6622_v33, %v836_v53  ;;  %v1006_v25 = vcombine.high %v6622_v33, %v836_v53  ;;  %6017 = vmatprep.mubr.msk.f32.mxu1 %vm6495_vm0, %v6494_v1  ;;  %v604_v26 = vcombine.high %v6754_v22, %v6757_v23 }
 0x197   :  { %v323_v27 = vrot.slane %v315_v12, %v6687_v58  ;;  %v330_v28 = vrot.slane %v316_v13, %v6687_v58  ;;  %v5734_v29 = vcombine.low %v307_v9, %v314_v11  ;;  %v5736_v30 = vcombine.high %v307_v9, %v314_v11 }
 0x198   :  { %6016 = vmatpush3.xpose.msk.msra.mxu1 %vm2079_vm2, %v1270_v21  ;;  %v1013_v15 = vrot.slane %v1005_v24, %v6682_v51  ;;  %v1020_v16 = vrot.slane %v1006_v25, %v6682_v51  ;;  %v1220_v33 = vrot.slane %v1206_v47, %v6687_v58  ;;  %v1252_v22 = vrot.slane %v1238_v49, %v6687_v58 }
 0x199   :  { %v6816_v23 = vrot.slane %v5734_v29, %v6682_v51  ;;  %v6819_v39 = vrot.slane %v5736_v30, %v6682_v51  ;;  %v5738_v40 = vcombine.low %v323_v27, %v330_v28  ;;  %v5740_v41 = vcombine.high %v323_v27, %v330_v28  ;;  %6020 = vmatprep.subr.mxu1 %v6494_v1  ;;  %v170_v43 = vpop.permute.xlu0 %169  ;;  %v176_v36 = vpop.permute.xlu1 %175 }
 0x19a   :  { %v1271_v44 = vcombine.low %v1220_v33, %v1252_v22  ;;  %v1021_v45 = vcombine.low %v830_v52, %v842_v14  ;;  %v1022_v31 = vcombine.high %v830_v52, %v842_v14  ;;  %v554_v32 = vrot.slane %v540_v8, %v6687_v58 }
 0x19b   :  { %v6827_v37 = vrot.slane %v5738_v40, %v6682_v51  ;;  %v6830_v47 = vrot.slane %v5740_v41, %v6682_v51  ;;  %v555_v49 = vcombine.low %v6816_v23, %v6819_v39  ;;  %v556_v46 = vcombine.high %v6816_v23, %v6819_v39  ;;  %6018 = vmatmul.mubr.msk.f32.vlgmr.msra.gmra.mxu1 %vm2079_vm2, %v604_v26 }
 0x19c   :  { %6021 = vmatpush3.xpose.msk.msra.mxu1 %vm2079_vm2, %v1271_v44  ;;  %v1029_v60 = vrot.slane %v1021_v45, %v6682_v51  ;;  %v1036_v61 = vrot.slane %v1022_v31, %v6682_v51  ;;  %6022 = vmatprep.mubr.msk.f32.mxu1 %vm6495_vm0, %v6494_v1  ;;  %v586_v8 = vrot.slane %v572_v10, %v6687_v58 }
 0x19d   :  { %v587_v48 = vcombine.low %v6827_v37, %v6830_v47  ;;  %v588_v50 = vcombine.high %v6827_v37, %v6830_v47  ;;  %6025 = vmatprep.subr.mxu1 %v6494_v1  ;;  %v1272_v52 = vcombine.high %v1220_v33, %v1252_v22  ;;  %v1229_v53 = vrot.slane %v1221_v4, %v6687_v58  ;;  %v6852_v59 = vpop.permute.xlu0 %847  ;;  %v6861_v21 = vpop.permute.xlu1 %853 }
 0x19e   :  { %v1069_v0 = vcombine.low %v1013_v15, %v1029_v60  ;;  %v1070_v2 = vcombine.high %v1013_v15, %v1029_v60  ;;  %v1085_v3 = vcombine.low %v1020_v16, %v1036_v61  ;;  %v1086_v9 = vcombine.high %v1020_v16, %v1036_v61 }
 0x19f   :  { %v605_v11 = vcombine.low %v554_v32, %v586_v8  ;;  %v1261_v62 = vrot.slane %v1253_v6, %v6687_v58  ;;  %v339_v63 = vcombine.low %v6628_v34, %v170_v43  ;;  %v340_v10 = vcombine.high %v6628_v34, %v170_v43 }
 0x1a0   :  { %v1077_v12 = vrot.slane %v1069_v0, %v6687_v58  ;;  %v1084_v13 = vrot.slane %v1070_v2, %v6687_v58  ;;  %v1093_v14 = vrot.slane %v1085_v3, %v6687_v58  ;;  %v1100_v4 = vrot.slane %v1086_v9, %v6687_v58 }
 0x1a1   :  { %6023 = vmatmul.mubr.msk.f32.vlgmr.msra.gmra.mxu1 %vm2079_vm2, %v605_v11  ;;  %v1273_v24 = vcombine.low %v1229_v53, %v1261_v62  ;;  %v347_v25 = vrot.slane %v339_v63, %v6682_v51  ;;  %v354_v6 = vrot.slane %v340_v10, %v6682_v51  ;;  %v355_v26 = vcombine.low %v6794_v19, %v176_v36  ;;  %v860_v30 = vpop.permute.xlu0 %859 }
 0x1a2   :  { %v5762_v34 = vcombine.low %v1077_v12, %v1084_v13  ;;  %v5764_v27 = vcombine.high %v1077_v12, %v1084_v13  ;;  %v5766_v28 = vcombine.low %v1093_v14, %v1100_v4  ;;  %v5768_v29 = vcombine.high %v1093_v14, %v1100_v4  ;;  %6026 = vmatpush3.xpose.msk.msra.mxu1 %vm2079_vm2, %v1272_v52 }
 0x1a3   :  { %6031 = vmatpush3.xpose.msk.msra.mxu0 %vm2079_vm2, %v1273_v24  ;;  %v356_v15 = vcombine.high %v6794_v19, %v176_v36  ;;  %v363_v16 = vrot.slane %v355_v26, %v6682_v51  ;;  %6027 = vmatprep.mubr.msk.f32.mxu1 %vm6495_vm0, %v6494_v1  ;;  %v606_v33 = vcombine.high %v554_v32, %v586_v8  ;;  %v866_v8 = vpop.permute.xlu1 %865 }
 0x1a4   :  { %v6874_v22 = vrot.slane %v5762_v34, %v6682_v51  ;;  %v6877_v40 = vrot.slane %v5764_v27, %v6682_v51  ;;  %v6880_v41 = vrot.slane %v5766_v28, %v6682_v51  ;;  %v6883_v43 = vrot.slane %v5768_v29, %v6682_v51  ;;  %6035 = vmatprep.subr.mxu1 %v6494_v1 }
 0x1a5   :  { %v370_v19 = vrot.slane %v356_v15, %v6682_v51  ;;  %v403_v44 = vcombine.low %v347_v25, %v363_v16  ;;  %v404_v45 = vcombine.high %v347_v25, %v363_v16  ;;  %6028 = vmatmul.mubr.msk.f32.vlgmr.msra.gmra.mxu1 %vm2079_vm2, %v606_v33  ;;  %v1274_v31 = vcombine.high %v1229_v53, %v1261_v62  ;;  %v6912_v62 = vpop.permute.xlu0 %181 }
 0x1a6   :  { %v1341_v32 = vcombine.low %v6874_v22, %v6877_v40  ;;  %v1342_v36 = vcombine.high %v6874_v22, %v6877_v40  ;;  %v1373_v60 = vcombine.low %v6880_v41, %v6883_v43  ;;  %v1374_v61 = vcombine.high %v6880_v41, %v6883_v43  ;;  %6037 = vmatprep.mubr.msk.f32.mxu1 %vm6495_vm0, %v6494_v1 }
 0x1a7   :  { %v411_v52 = vrot.slane %v403_v44, %v6687_v58  ;;  %v418_v53 = vrot.slane %v404_v45, %v6687_v58  ;;  %v419_v0 = vcombine.low %v354_v6, %v370_v19  ;;  %v420_v2 = vcombine.high %v354_v6, %v370_v19  ;;  %6036 = vmatpush3.xpose.msk.msra.mxu1 %vm2079_vm2, %v1274_v31  ;;  %v188_v56 = vpop.permute.xlu1 %187 }
 0x1a8   :  { %6040 = vmatprep.subr.mxu0 %v6494_v1  ;;  %6045 = vmatprep.subr.mxu1 %v6494_v1  ;;  %v563_v3 = vrot.slane %v555_v49, %v6687_v58  ;;  %v595_v9 = vrot.slane %v587_v48, %v6687_v58  ;;  %v1236_v11 = vrot.slane %v1222_v5, %v6687_v58 }
 0x1a9   :  { %v427_v63 = vrot.slane %v419_v0, %v6687_v58  ;;  %v434_v10 = vrot.slane %v420_v2, %v6687_v58  ;;  %v5741_v12 = vcombine.low %v411_v52, %v418_v53  ;;  %v5743_v13 = vcombine.high %v411_v52, %v418_v53 }
 0x1aa   :  { %v607_v14 = vcombine.low %v563_v3, %v595_v9  ;;  %v608_v4 = vcombine.high %v563_v3, %v595_v9  ;;  %v1268_v49 = vrot.slane %v1254_v7, %v6687_v58  ;;  %v1037_v48 = vcombine.low %v6852_v59, %v860_v30 }
 0x1ab   :  { %v6922_v54 = vrot.slane %v5741_v12, %v6682_v51  ;;  %v6925_v55 = vrot.slane %v5743_v13, %v6682_v51  ;;  %v5745_v5 = vcombine.low %v427_v63, %v434_v10  ;;  %v5747_v24 = vcombine.high %v427_v63, %v434_v10  ;;  %v200_v37 = vpop.permute.xlu1 %199 }
 0x1ac   :  { %6033 = vmatmul.mubr.msk.f32.vlgmr.msra.gmra.mxu0 %vm2079_vm2, %v607_v14  ;;  %6038 = vmatmul.mubr.msk.f32.vlgmr.msra.gmra.mxu1 %vm2079_vm2, %v608_v4  ;;  %v1275_v25 = vcombine.low %v1236_v11, %v1268_v49  ;;  %v1276_v6 = vcombine.high %v1236_v11, %v1268_v49  ;;  %v1038_v26 = vcombine.high %v6852_v59, %v860_v30  ;;  %v194_v30 = vpop.permute.xlu0 %193 }
 0x1ad   :  { %v6931_v57 = vrot.slane %v5745_v5, %v6682_v51  ;;  %v6934_v7 = vrot.slane %v5747_v24, %v6682_v51  ;;  %v675_v34 = vcombine.low %v6922_v54, %v6925_v55  ;;  %v676_v27 = vcombine.high %v6922_v54, %v6925_v55  ;;  %6042 = vmatprep.mubr.msk.f32.mxu0 %vm6495_vm0, %v6494_v1 }
 0x1ae   :  { %6041 = vmatpush3.xpose.msk.msra.mxu0 %vm2079_vm2, %v1275_v25  ;;  %6046 = vmatpush3.xpose.msk.msra.mxu1 %vm2079_vm2, %v1276_v6  ;;  %v1045_v59 = vrot.slane %v1037_v48, %v6682_v51  ;;  %v1052_v28 = vrot.slane %v1038_v26, %v6682_v51  ;;  %v1053_v29 = vcombine.low %v6861_v21, %v866_v8 }
 0x1af   :  { %v707_v15 = vcombine.low %v6931_v57, %v6934_v7  ;;  %v708_v16 = vcombine.high %v6931_v57, %v6934_v7  ;;  %v1054_v33 = vcombine.high %v6861_v21, %v866_v8  ;;  %6047 = vmatprep.mubr.msk.f32.mxu1 %vm6495_vm0, %v6494_v1  ;;  %v570_v19 = vrot.slane %v556_v46, %v6687_v58  ;;  %v6982_v4 = vpop.permute.xlu1 %1493 }
 0x1b0   :  { %v1061_v44 = vrot.slane %v1053_v29, %v6682_v51  ;;  %v602_v45 = vrot.slane %v588_v50, %v6687_v58  ;;  %6050 = vmatprep.subr.mxu0 %v6494_v1  ;;  %6055 = vmatprep.subr.mxu1 %v6494_v1  ;;  %v1349_v21 = vrot.slane %v1341_v32, %v6687_v58 }
 0x1b1   :  { %v1068_v31 = vrot.slane %v1054_v33, %v6682_v51  ;;  %v1381_v8 = vrot.slane %v1373_v60, %v6687_v58  ;;  %v371_v23 = vcombine.low %v6912_v62, %v194_v30  ;;  %v372_v39 = vcombine.high %v6912_v62, %v194_v30 }
 0x1b2   :  { %v1101_v46 = vcombine.low %v1045_v59, %v1061_v44  ;;  %v1102_v52 = vcombine.high %v1045_v59, %v1061_v44  ;;  %v609_v53 = vcombine.low %v570_v19, %v602_v45  ;;  %v610_v0 = vcombine.high %v570_v19, %v602_v45 }
 0x1b3   :  { %v1117_v47 = vcombine.low %v1052_v28, %v1068_v31  ;;  %v1118_v50 = vcombine.high %v1052_v28, %v1068_v31  ;;  %v1405_v2 = vcombine.low %v1349_v21, %v1381_v8  ;;  %v1406_v3 = vcombine.high %v1349_v21, %v1381_v8 }
 0x1b4   :  { %v1109_v9 = vrot.slane %v1101_v46, %v6687_v58  ;;  %v1116_v32 = vrot.slane %v1102_v52, %v6687_v58  ;;  %6043 = vmatmul.mubr.msk.f32.vlgmr.msra.gmra.mxu0 %vm2079_vm2, %v609_v53  ;;  %6048 = vmatmul.mubr.msk.f32.vlgmr.msra.gmra.mxu1 %vm2079_vm2, %v610_v0  ;;  %v379_v60 = vrot.slane %v371_v23, %v6682_v51  ;;  %v7014_v53 = vpop.permute.xlu0 %1499 }
 0x1b5   :  { %v1125_v11 = vrot.slane %v1117_v47, %v6687_v58  ;;  %v1132_v62 = vrot.slane %v1118_v50, %v6687_v58  ;;  %6051 = vmatpush3.xpose.msk.msra.mxu0 %vm2079_vm2, %v1405_v2  ;;  %6056 = vmatpush3.xpose.msk.msra.mxu1 %vm2079_vm2, %v1406_v3  ;;  %v386_v63 = vrot.slane %v372_v39, %v6682_v51 }
 0x1b6   :  { %v5763_v10 = vcombine.low %v1109_v9, %v1116_v32  ;;  %v5765_v12 = vcombine.high %v1109_v9, %v1116_v32  ;;  %v387_v13 = vcombine.low %v188_v56, %v200_v37  ;;  %v388_v14 = vcombine.high %v188_v56, %v200_v37  ;;  %6052 = vmatprep.mubr.msk.f32.mxu0 %vm6495_vm0, %v6494_v1 }
 0x1b7   :  { %v5767_v49 = vcombine.low %v1125_v11, %v1132_v62  ;;  %v5769_v48 = vcombine.high %v1125_v11, %v1132_v62  ;;  %6057 = vmatprep.mubr.msk.f32.mxu1 %vm6495_vm0, %v6494_v1  ;;  %6060 = vmatprep.subr.mxu0 %v6494_v1  ;;  %v683_v5 = vrot.slane %v675_v34, %v6687_v58 }
 0x1b8   :  { %v1292_v24 = vrot.slane %v5763_v10, %v6682_v51  ;;  %v1308_v25 = vrot.slane %v5765_v12, %v6682_v51  ;;  %v395_v6 = vrot.slane %v387_v13, %v6682_v51  ;;  %v402_v26 = vrot.slane %v388_v14, %v6682_v51  ;;  %6065 = vmatprep.subr.mxu1 %v6494_v1  ;;  %v1512_v12 = vpop.permute.xlu0 %1511 }
 0x1b9   :  { %v1324_v56 = vrot.slane %v5767_v49, %v6682_v51  ;;  %v1340_v59 = vrot.slane %v5769_v48, %v6682_v51  ;;  %v715_v28 = vrot.slane %v707_v15, %v6687_v58  ;;  %v1356_v34 = vrot.slane %v1342_v36, %v6687_v58  ;;  %v7002_v15 = vpop.permute.xlu1 %1505 }
 0x1ba   :  { %v1357_v29 = vcombine.low %v1292_v24, %v1308_v25  ;;  %v1358_v30 = vcombine.high %v1292_v24, %v1308_v25  ;;  %v435_v33 = vcombine.low %v379_v60, %v395_v6  ;;  %v436_v19 = vcombine.high %v379_v60, %v395_v6 }
 0x1bb   :  { %v1389_v44 = vcombine.low %v1324_v56, %v1340_v59  ;;  %v1390_v45 = vcombine.high %v1324_v56, %v1340_v59  ;;  %v451_v21 = vcombine.low %v386_v63, %v402_v26  ;;  %v452_v31 = vcombine.high %v386_v63, %v402_v26 }
 0x1bc   :  { %v443_v8 = vrot.slane %v435_v33, %v6687_v58  ;;  %v450_v23 = vrot.slane %v436_v19, %v6687_v58  ;;  %v739_v39 = vcombine.low %v683_v5, %v715_v28  ;;  %v740_v46 = vcombine.high %v683_v5, %v715_v28 }
 0x1bd   :  { %v459_v52 = vrot.slane %v451_v21, %v6687_v58  ;;  %v466_v22 = vrot.slane %v452_v31, %v6687_v58  ;;  %v1388_v40 = vrot.slane %v1374_v61, %v6687_v58  ;;  %v690_v36 = vrot.slane %v676_v27, %v6687_v58  ;;  %v1518_v60 = vpop.permute.xlu1 %1517  ;;  %v1530_v31 = vpop.permute.xlu0 %1529 }
 0x1be   :  { %v5742_v0 = vcombine.low %v443_v8, %v450_v23  ;;  %v5744_v37 = vcombine.high %v443_v8, %v450_v23  ;;  %6053 = vmatmul.mubr.msk.f32.vlgmr.msra.gmra.mxu0 %vm2079_vm2, %v739_v39  ;;  %6058 = vmatmul.mubr.msk.f32.vlgmr.msra.gmra.mxu1 %vm2079_vm2, %v740_v46  ;;  %v722_v47 = vrot.slane %v708_v16, %v6687_v58 }
 0x1bf   :  { %v5746_v41 = vcombine.low %v459_v52, %v466_v22  ;;  %v5748_v43 = vcombine.high %v459_v52, %v466_v22  ;;  %v1407_v61 = vcombine.low %v1356_v34, %v1388_v40  ;;  %v1408_v50 = vcombine.high %v1356_v34, %v1388_v40  ;;  %6062 = vmatprep.mubr.msk.f32.mxu0 %vm6495_vm0, %v6494_v1 }
 0x1c0   :  { %v626_v54 = vrot.slane %v5742_v0, %v6682_v51  ;;  %v642_v55 = vrot.slane %v5744_v37, %v6682_v51  ;;  %6067 = vmatprep.mubr.msk.f32.mxu1 %vm6495_vm0, %v6494_v1  ;;  %v741_v27 = vcombine.low %v690_v36, %v722_v47  ;;  %v742_v2 = vcombine.high %v690_v36, %v722_v47 }
 0x1c1   :  { %v658_v3 = vrot.slane %v5746_v41, %v6682_v51  ;;  %v674_v57 = vrot.slane %v5748_v43, %v6682_v51  ;;  %6061 = vmatpush3.xpose.msk.msra.mxu0 %vm2079_vm2, %v1407_v61  ;;  %6066 = vmatpush3.xpose.msk.msra.mxu1 %vm2079_vm2, %v1408_v50  ;;  %v1365_v7 = vrot.slane %v1357_v29, %v6687_v58  ;;  %v1524_v19 = vpop.permute.xlu1 %1523 }
 0x1c2   :  { %v691_v16 = vcombine.low %v626_v54, %v642_v55  ;;  %v692_v9 = vcombine.high %v626_v54, %v642_v55  ;;  %6070 = vmatprep.subr.mxu0 %v6494_v1  ;;  %6075 = vmatprep.subr.mxu1 %v6494_v1  ;;  %v1397_v32 = vrot.slane %v1389_v44, %v6687_v58 }
 0x1c3   :  { %v723_v11 = vcombine.low %v658_v3, %v674_v57  ;;  %v724_v62 = vcombine.high %v658_v3, %v674_v57  ;;  %v1372_v63 = vrot.slane %v1358_v30, %v6687_v58  ;;  %v1404_v10 = vrot.slane %v1390_v45, %v6687_v58 }
 0x1c4   :  { %6063 = vmatmul.mubr.msk.f32.vlgmr.msra.gmra.mxu0 %vm2079_vm2, %v741_v27  ;;  %6068 = vmatmul.mubr.msk.f32.vlgmr.msra.gmra.mxu1 %vm2079_vm2, %v742_v2  ;;  %v1409_v13 = vcombine.low %v1365_v7, %v1397_v32  ;;  %v1410_v14 = vcombine.high %v1365_v7, %v1397_v32  ;;  %v699_v49 = vrot.slane %v691_v16, %v6687_v58 }
 0x1c5   :  { %6072 = vmatprep.mubr.msk.f32.mxu0 %vm6495_vm0, %v6494_v1  ;;  %6077 = vmatprep.mubr.msk.f32.mxu1 %vm6495_vm0, %v6494_v1  ;;  %v731_v48 = vrot.slane %v723_v11, %v6687_v58  ;;  %v1411_v5 = vcombine.low %v1372_v63, %v1404_v10  ;;  %v1412_v24 = vcombine.high %v1372_v63, %v1404_v10 }
 0x1c6   :  { %6071 = vmatpush3.xpose.msk.msra.mxu0 %vm2079_vm2, %v1409_v13  ;;  %6076 = vmatpush3.xpose.msk.msra.mxu1 %vm2079_vm2, %v1410_v14  ;;  %v706_v25 = vrot.slane %v692_v9, %v6687_v58  ;;  %v738_v6 = vrot.slane %v724_v62, %v6687_v58  ;;  %v1551_v26 = vcombine.low %v6982_v4, %v7002_v15 }
 0x1c7   :  { %6080 = vmatprep.subr.mxu0 %v6494_v1  ;;  %6085 = vmatprep.subr.mxu1 %v6494_v1  ;;  %v743_v56 = vcombine.low %v699_v49, %v731_v48  ;;  %v744_v59 = vcombine.high %v699_v49, %v731_v48  ;;  %v1552_v28 = vcombine.high %v6982_v4, %v7002_v15 }
 0x1c8   :  { %v745_v34 = vcombine.low %v706_v25, %v738_v6  ;;  %v746_v29 = vcombine.high %v706_v25, %v738_v6  ;;  %v1559_v30 = vrot.slane %v1551_v26, %v6682_v51  ;;  %v1535_v33 = vcombine.low %v6657_v38, %v7014_v53 }
 0x1c9   :  { %6073 = vmatmul.mubr.msk.f32.vlgmr.msra.gmra.mxu0 %vm2079_vm2, %v743_v56  ;;  %6078 = vmatmul.mubr.msk.f32.vlgmr.msra.gmra.mxu1 %vm2079_vm2, %v744_v59  ;;  %v1566_v44 = vrot.slane %v1552_v28, %v6682_v51  ;;  %v1536_v45 = vcombine.high %v6657_v38, %v7014_v53  ;;  %v1567_v21 = vcombine.low %v1512_v12, %v1524_v19 }
 0x1ca   :  { %6081 = vmatpush3.xpose.msk.msra.mxu0 %vm2079_vm2, %v1411_v5  ;;  %6086 = vmatpush3.xpose.msk.msra.mxu1 %vm2079_vm2, %v1412_v24  ;;  %v1543_v4 = vrot.slane %v1535_v33, %v6682_v51  ;;  %v1568_v8 = vcombine.high %v1512_v12, %v1524_v19  ;;  %v1583_v23 = vcombine.low %v1518_v60, %v1530_v31 }
 0x1cb   :  { %6082 = vmatprep.mubr.msk.f32.mxu0 %vm6495_vm0, %v6494_v1  ;;  %6087 = vmatprep.mubr.msk.f32.mxu1 %vm6495_vm0, %v6494_v1  ;;  %v1550_v39 = vrot.slane %v1536_v45, %v6682_v51  ;;  %v1575_v38 = vrot.slane %v1567_v21, %v6682_v51  ;;  %v1584_v46 = vcombine.high %v1518_v60, %v1530_v31 }
 0x1cc   :  { %v1599_v15 = vcombine.low %v1543_v4, %v1559_v30  ;;  %v1600_v52 = vcombine.high %v1543_v4, %v1559_v30  ;;  %v1582_v22 = vrot.slane %v1568_v8, %v6682_v51  ;;  %v1591_v40 = vrot.slane %v1583_v23, %v6682_v51  ;;  %6090 = vmatprep.subr.mxu0 %v6494_v1 }
 0x1cd   :  { %6083 = vmatmul.mubr.msk.f32.vlgmr.msra.gmra.mxu0 %vm2079_vm2, %v745_v34  ;;  %6088 = vmatmul.mubr.msk.f32.vlgmr.msra.gmra.mxu1 %vm2079_vm2, %v746_v29  ;;  %v1615_v36 = vcombine.low %v1550_v39, %v1566_v44  ;;  %v1616_v53 = vcombine.high %v1550_v39, %v1566_v44  ;;  %v1598_v0 = vrot.slane %v1584_v46, %v6682_v51 }
 0x1ce   :  { %v1607_v37 = vrot.slane %v1599_v15, %v6687_v58  ;;  %v1614_v47 = vrot.slane %v1600_v52, %v6687_v58  ;;  %v1631_v41 = vcombine.low %v1575_v38, %v1591_v40  ;;  %v1632_v43 = vcombine.high %v1575_v38, %v1591_v40  ;;  %6095 = vmatprep.subr.mxu1 %v6494_v1 }
 0x1cf   :  { %v1623_v61 = vrot.slane %v1615_v36, %v6687_v58  ;;  %v1630_v50 = vrot.slane %v1616_v53, %v6687_v58  ;;  %v1647_v54 = vcombine.low %v1582_v22, %v1598_v0  ;;  %v1648_v55 = vcombine.high %v1582_v22, %v1598_v0  ;;  %6092 = vmatprep.mubr.msk.f32.mxu0 %vm6495_vm0, %v6494_v1 }
 0x1d0   :  { %v5775_v27 = vcombine.low %v1607_v37, %v1614_v47  ;;  %v5777_v2 = vcombine.high %v1607_v37, %v1614_v47  ;;  %v1639_v3 = vrot.slane %v1631_v41, %v6687_v58  ;;  %v1646_v57 = vrot.slane %v1632_v43, %v6687_v58  ;;  %6097 = vmatprep.mubr.msk.f32.mxu1 %vm6495_vm0, %v6494_v1 }
 0x1d1   :  { %v5779_v7 = vcombine.low %v1623_v61, %v1630_v50  ;;  %v5781_v16 = vcombine.high %v1623_v61, %v1630_v50  ;;  %v1655_v9 = vrot.slane %v1647_v54, %v6687_v58  ;;  %v1662_v32 = vrot.slane %v1648_v55, %v6687_v58 }
 0x1d2   :  { %v1815_v60 = vrot.slane %v5775_v27, %v6682_v51  ;;  %v1831_v11 = vrot.slane %v5777_v2, %v6682_v51  ;;  %v5776_v62 = vcombine.low %v1639_v3, %v1646_v57  ;;  %v5778_v63 = vcombine.high %v1639_v3, %v1646_v57 }
 0x1d3   :  { %v1847_v10 = vrot.slane %v5779_v7, %v6682_v51  ;;  %v1863_v12 = vrot.slane %v5781_v16, %v6682_v51  ;;  %v5780_v13 = vcombine.low %v1655_v9, %v1662_v32  ;;  %v5782_v14 = vcombine.high %v1655_v9, %v1662_v32 }
 0x1d4   :  { %v1871_v49 = vcombine.low %v1815_v60, %v1831_v11  ;;  %v1872_v5 = vcombine.high %v1815_v60, %v1831_v11  ;;  %v1822_v30 = vrot.slane %v5776_v62, %v6682_v51  ;;  %v1838_v33 = vrot.slane %v5778_v63, %v6682_v51 }
 0x1d5   :  { %v1903_v48 = vcombine.low %v1847_v10, %v1863_v12  ;;  %v1904_v24 = vcombine.high %v1847_v10, %v1863_v12  ;;  %v1854_v19 = vrot.slane %v5780_v13, %v6682_v51  ;;  %v1870_v44 = vrot.slane %v5782_v14, %v6682_v51 }
 0x1d6   :  { %v1879_v25 = vrot.slane %v1871_v49, %v6687_v58  ;;  %v7099_v59 = vrot.slane %v1872_v5, %v6687_v58  ;;  %v1887_v45 = vcombine.low %v1822_v30, %v1838_v33  ;;  %v1888_v31 = vcombine.high %v1822_v30, %v1838_v33 }
 0x1d7   :  { %v1911_v6 = vrot.slane %v1903_v48, %v6687_v58  ;;  %v7102_v28 = vrot.slane %v1904_v24, %v6687_v58  ;;  %v1919_v21 = vcombine.low %v1854_v19, %v1870_v44  ;;  %v1920_v4 = vcombine.high %v1854_v19, %v1870_v44 }
 0x1d8   :  { %v7115_v8 = vrot.slane %v1887_v45, %v6687_v58  ;;  %v7121_v39 = vrot.slane %v1888_v31, %v6687_v58 }
 0x1d9   :  { %v1935_v26 = vcombine.low %v1879_v25, %v1911_v6  ;;  %v1936_v56 = vcombine.high %v1879_v25, %v1911_v6  ;;  %v1937_v34 = vcombine.low %v7099_v59, %v7102_v28  ;;  %v1938_v29 = vcombine.high %v7099_v59, %v7102_v28 }
 0x1da   :  { %v7118_v23 = vrot.slane %v1919_v21, %v6687_v58  ;;  %v7124_v38 = vrot.slane %v1920_v4, %v6687_v58 }
 0x1db   :  { %6091 = vmatpush3.msra.mxu0 %v1935_v26  ;;  %6096 = vmatpush3.msra.mxu1 %v1936_v56 }
 0x1dc   :  { %6100 = vmatprep.subr.mxu0 %v6494_v1  ;;  %6105 = vmatprep.subr.mxu1 %v6494_v1  ;;  %v1939_v46 = vcombine.low %v7115_v8, %v7118_v23  ;;  %v1940_v15 = vcombine.high %v7115_v8, %v7118_v23  ;;  %v1941_v52 = vcombine.low %v7121_v39, %v7124_v38 }
 0x1dd   :  { %v1942_v22 = vcombine.high %v7121_v39, %v7124_v38 }
 0x255   :  { %v2152_v40 = vpop.f32.mrf.mxu1 }
 0x256   :  { %v7134_v36 = vmul.f32 0.35355338, %v2152_v40 }
 0x257   :  { %v6014_v53 = vpop.f32.mrf.mxu1 }
 0x258   :  { %v3312_v0 = vsel %vm2079_vm2, %v7134_v36, -inf }
 0x259   :  { %3313 = vmax.xlane.f32.xlu0 %v3312_v0 }
 0x25b   :  { %v2228_v37 = vpop.f32.mrf.mxu1 }
 0x25c   :  { %v7150_v60 = vmul.f32 0.35355338, %v2228_v37 }
 0x25d   :  { %v6019_v47 = vpop.f32.mrf.mxu1 }
 0x25e   :  { %v3315_v63 = vsel %vm2079_vm2, %v7150_v60, -inf }
 0x261   :  { %v2304_v41 = vpop.f32.mrf.mxu1 }
 0x262   :  { %v7138_v43 = vmul.f32 0.35355338, %v2304_v41 }
 0x263   :  { %v6024_v61 = vpop.f32.mrf.mxu1 }
 0x264   :  { %v3318_v50 = vsel %vm2079_vm2, %v7138_v43, -inf }
 0x265   :  { %v2380_v54 = vpop.f32.mrf.mxu1  ;;  %3319 = vmax.xlane.f32.xlu0 %v3318_v50 }
 0x266   :  { %v7142_v55 = vmul.f32 0.35355338, %v2380_v54 }
 0x267   :  { %v6029_v27 = vpop.f32.mrf.mxu1 }
 0x268   :  { %v3321_v2 = vsel %vm2079_vm2, %v7142_v55, -inf }
 0x269   :  { %3322 = vmax.xlane.f32.xlu0 %v3321_v2 }
 0x26c   :  { %v2532_v3 = vpop.f32.mrf.mxu1  ;;  %v2456_v57 = vpop.f32.mrf.mxu0 }
 0x26d   :  { %v7146_v7 = vmul.f32 0.35355338, %v2532_v3  ;;  %v7148_v16 = vmul.f32 0.35355338, %v2456_v57 }
 0x26e   :  { %v6034_v9 = vpop.f32.mrf.mxu0  ;;  %v6039_v32 = vpop.f32.mrf.mxu1 }
 0x26f   :  { %v3327_v11 = vsel %vm2079_vm2, %v7146_v7, -inf  ;;  %v3324_v62 = vsel %vm2079_vm2, %v7148_v16, -inf }
 0x270   :  { %3328 = vmax.xlane.f32.xlu0 %v3327_v11  ;;  %3325 = vmax.xlane.f32.xlu1 %v3324_v62 }
 0x274   :  { %v2684_v10 = vpop.f32.mrf.mxu1  ;;  %v2608_v12 = vpop.f32.mrf.mxu0  ;;  %3316 = vmax.xlane.f32.xlu1 %v3315_v63 }
 0x275   :  { %v7158_v13 = vmul.f32 0.35355338, %v2684_v10  ;;  %v7160_v14 = vmul.f32 0.35355338, %v2608_v12 }
 0x276   :  { %v6044_v49 = vpop.f32.mrf.mxu0  ;;  %v6049_v48 = vpop.f32.mrf.mxu1 }
 0x277   :  { %v3333_v5 = vsel %vm2079_vm2, %v7158_v13, -inf  ;;  %v3330_v24 = vsel %vm2079_vm2, %v7160_v14, -inf  ;;  %v7202_v49 = vpop.permute.xlu0 %1495 }
 0x278   :  { %3334 = vmax.xlane.f32.xlu0 %v3333_v5  ;;  %3331 = vmax.xlane.f32.xlu1 %v3330_v24 }
 0x27e   :  { %v2836_v25 = vpop.f32.mrf.mxu1  ;;  %v2760_v6 = vpop.f32.mrf.mxu0 }
 0x27f   :  { %v7166_v26 = vmul.f32 0.35355338, %v2836_v25  ;;  %v7168_v56 = vmul.f32 0.35355338, %v2760_v6  ;;  %v7205_v25 = vpop.permute.xlu1 %1501 }
 0x280   :  { %v6054_v30 = vpop.f32.mrf.mxu0  ;;  %v6059_v33 = vpop.f32.mrf.mxu1 }
 0x281   :  { %v3339_v19 = vsel %vm2079_vm2, %v7166_v26, -inf  ;;  %v3336_v44 = vsel %vm2079_vm2, %v7168_v56, -inf }
 0x282   :  { %3340 = vmax.xlane.f32.xlu0 %v3339_v19  ;;  %3337 = vmax.xlane.f32.xlu1 %v3336_v44 }
 0x283   :  { %v7209_v30 = vpop.permute.xlu1 %1507 }
 0x284   :  { %v2988_v45 = vpop.f32.mrf.mxu1  ;;  %v2912_v21 = vpop.f32.mrf.mxu0 }
 0x285   :  { %v7174_v31 = vmul.f32 0.35355338, %v2988_v45  ;;  %v7176_v4 = vmul.f32 0.35355338, %v2912_v21 }
 0x286   :  { %v6064_v40 = vpop.f32.mrf.mxu0  ;;  %v6069_v53 = vpop.f32.mrf.mxu1 }
 0x287   :  { %v3345_v0 = vsel %vm2079_vm2, %v7174_v31, -inf  ;;  %v3342_v37 = vsel %vm2079_vm2, %v7176_v4, -inf }
 0x288   :  { %3346 = vmax.xlane.f32.xlu0 %v3345_v0  ;;  %3343 = vmax.xlane.f32.xlu1 %v3342_v37 }
 0x289   :  { %v3064_v47 = vpop.f32.mrf.mxu0  ;;  %v3140_v41 = vpop.f32.mrf.mxu1 }
 0x28a   :  { %v7182_v61 = vmul.f32 0.35355338, %v3064_v47  ;;  %v7184_v50 = vmul.f32 0.35355338, %v3140_v41 }
 0x28b   :  { %v6074_v54 = vpop.f32.mrf.mxu0  ;;  %v6079_v27 = vpop.f32.mrf.mxu1 }
 0x28c   :  { %v3351_v2 = vsel %vm2079_vm2, %v7184_v50, -inf  ;;  %v3348_v3 = vsel %vm2079_vm2, %v7182_v61, -inf }
 0x28d   :  { %v3292_v57 = vpop.f32.mrf.mxu1  ;;  %3352 = vmax.xlane.f32.xlu0 %v3351_v2  ;;  %3349 = vmax.xlane.f32.xlu1 %v3348_v3  ;;  %v3216_v9 = vpop.f32.mrf.mxu0 }
 0x28e   :  { %v7190_v32 = vmul.f32 0.35355338, %v3292_v57  ;;  %v7192_v11 = vmul.f32 0.35355338, %v3216_v9 }
 0x28f   :  { %v6084_v62 = vpop.f32.mrf.mxu0  ;;  %v6089_v63 = vpop.f32.mrf.mxu1 }
 0x290   :  { %v3357_v10 = vsel %vm2079_vm2, %v7190_v32, -inf  ;;  %v3354_v12 = vsel %vm2079_vm2, %v7192_v11, -inf }
 0x291   :  { %3358 = vmax.xlane.f32.xlu0 %v3357_v10  ;;  %3355 = vmax.xlane.f32.xlu1 %v3354_v12 }
 0x2a2   :  { %1519 = vrot.lane.b32.xlu1 %v6671_v42, %s6500_s11 }
 0x2a7   :  { %1513 = vrot.lane.b32.xlu0 %v6671_v42, %s6499_s10 }
 0x2e2   :  { %v3314_v48 = vpop.xlane.xlu0 %3313 }
 0x2e3   :  { %v3360_v5 = vsub.f32 %v7134_v36, %v3314_v48 }
 0x2e5   :  { %v3376_v24 = vmul.f32 1.442695, %v3360_v5 }
 0x2e7   :  { %6307 = vpow2.f32 %v3376_v24 }
 0x2ee   :  { %v3320_v19 = vpop.xlane.xlu0 %3319 }
 0x2ef   :  { %v3362_v37 = vsub.f32 %v7138_v43, %v3320_v19 }
 0x2f1   :  { %v3380_v2 = vmul.f32 1.442695, %v3362_v37 }
 0x2f2   :  { %v3323_v21 = vpop.xlane.xlu0 %3322 }
 0x2f4   :  { %v7207_v6 = vpop.eup %6307 }
 0x2f5   :  { %v3408_v33 = vsel %vm2079_vm2, %v7207_v6, 0.0 }
 0x2f6   :  { %3409 = vadd.xlane.f32.xlu1 %v3408_v33 }
 0x2f9   :  { %v3326_v44 = vpop.xlane.xlu1 %3325  ;;  %v3329_v41 = vpop.xlane.xlu0 %3328 }
 0x2fa   :  { %v3364_v45 = vsub.f32 %v7148_v16, %v3326_v44  ;;  %v3363_v16 = vsub.f32 %v7142_v55, %v3323_v21  ;;  %v3365_v63 = vsub.f32 %v7146_v7, %v3329_v41 }
 0x2fc   :  { %v3384_v40 = vmul.f32 1.442695, %v3364_v45  ;;  %v3382_v12 = vmul.f32 1.442695, %v3363_v16  ;;  %v3386_v24 = vmul.f32 1.442695, %v3365_v63 }
 0x2fd   :  { %v3317_v53 = vpop.xlane.xlu1 %3316 }
 0x2fe   :  { %v3361_v36 = vsub.f32 %v7150_v60, %v3317_v53  ;;  %6309 = vpow2.f32 %v3384_v40 }
 0x300   :  { %v3378_v0 = vmul.f32 1.442695, %v3361_v36 }
 0x301   :  { %v3332_v47 = vpop.xlane.xlu1 %3331  ;;  %v3335_v3 = vpop.xlane.xlu0 %3334 }
 0x302   :  { %6311 = vpow2.f32 %v3378_v0  ;;  %v3366_v54 = vsub.f32 %v7160_v14, %v3332_v47 }
 0x304   :  { %v3388_v27 = vmul.f32 1.442695, %v3366_v54 }
 0x306   :  { %6313 = vpow2.f32 %v3388_v27 }
 0x307   :  { %6315 = vpow2.f32 %v3380_v2 }
 0x30b   :  { %v3338_v57 = vpop.xlane.xlu1 %3337  ;;  %v7218_v9 = vpop.eup %6309 }
 0x30c   :  { %v3341_v60 = vpop.xlane.xlu0 %3340  ;;  %v3368_v62 = vsub.f32 %v7168_v56, %v3338_v57  ;;  %v3420_v43 = vsel %vm2079_vm2, %v7218_v9, 0.0 }
 0x30d   :  { %3421 = vadd.xlane.f32.xlu1 %v3420_v43  ;;  %v3369_v55 = vsub.f32 %v7166_v26, %v3341_v60  ;;  %v3367_v26 = vsub.f32 %v7158_v13, %v3335_v3 }
 0x30e   :  { %v3392_v10 = vmul.f32 1.442695, %v3368_v62 }
 0x30f   :  { %v7224_v14 = vpop.eup %6311  ;;  %v3394_v44 = vmul.f32 1.442695, %v3369_v55  ;;  %v3390_v41 = vmul.f32 1.442695, %v3367_v26 }
 0x310   :  { %v3411_v48 = vsel %vm2079_vm2, %v7224_v14, 0.0  ;;  %6317 = vpow2.f32 %v3392_v10 }
 0x311   :  { %v3344_v5 = vpop.xlane.xlu1 %3343  ;;  %3412 = vadd.xlane.f32.xlu0 %v3411_v48  ;;  %v3347_v56 = vpop.xlane.xlu0 %3346  ;;  %6319 = vpow2.f32 %v3382_v12 }
 0x312   :  { %v3370_v33 = vsub.f32 %v7176_v4, %v3344_v5  ;;  %6321 = vpow2.f32 %v3386_v24 }
 0x313   :  { %v7230_v19 = vpop.eup %6313 }
 0x314   :  { %v3396_v7 = vmul.f32 1.442695, %v3370_v33  ;;  %v3426_v45 = vsel %vm2079_vm2, %v7230_v19, 0.0  ;;  %v7234_v21 = vpop.eup %6315 }
 0x315   :  { %3427 = vadd.xlane.f32.xlu1 %v3426_v45  ;;  %v3414_v47 = vsel %vm2079_vm2, %v7234_v21, 0.0 }
 0x316   :  { %v3353_v40 = vpop.xlane.xlu0 %3352  ;;  %v3350_v53 = vpop.xlane.xlu1 %3349  ;;  %6323 = vpow2.f32 %v3396_v7 }
 0x317   :  { %v3373_v36 = vsub.f32 %v7184_v50, %v3353_v40  ;;  %v3372_v4 = vsub.f32 %v7182_v61, %v3350_v53  ;;  %6325 = vpow2.f32 %v3394_v44  ;;  %v3371_v61 = vsub.f32 %v7174_v31, %v3347_v56 }
 0x319   :  { %v3402_v0 = vmul.f32 1.442695, %v3373_v36  ;;  %v3400_v37 = vmul.f32 1.442695, %v3372_v4  ;;  %3415 = vadd.xlane.f32.xlu1 %v3414_v47 }
 0x31a   :  { %v3359_v54 = vpop.xlane.xlu0 %3358  ;;  %v3356_v27 = vpop.xlane.xlu1 %3355 }
 0x31b   :  { %6327 = vpow2.f32 %v3402_v0  ;;  %v3375_v13 = vsub.f32 %v7190_v32, %v3359_v54  ;;  %v3374_v2 = vsub.f32 %v7192_v11, %v3356_v27  ;;  %v3398_v32 = vmul.f32 1.442695, %v3371_v61 }
 0x31c   :  { %6329 = vpow2.f32 %v3400_v37  ;;  %v1687_v27 = vcombine.low %v7202_v49, %v7209_v30 }
 0x31d   :  { %v3406_v3 = vmul.f32 1.442695, %v3375_v13  ;;  %v7243_v50 = vpop.eup %6317  ;;  %6331 = vpow2.f32 %v3390_v41  ;;  %v3404_v57 = vmul.f32 1.442695, %v3374_v2  ;;  %v1671_v41 = vcombine.low %v6671_v42, %v7205_v25 }
 0x31e   :  { %v3432_v16 = vsel %vm2079_vm2, %v7243_v50, 0.0  ;;  %v7248_v60 = vpop.eup %6319  ;;  %v7292_v36 = vpop.permute.xlu1 %1519  ;;  %v1695_v61 = vrot.slane %v1687_v27, %v6682_v51 }
 0x31f   :  { %6333 = vpow2.f32 %v3406_v3  ;;  %3433 = vadd.xlane.f32.xlu0 %v3432_v16  ;;  %v7250_v62 = vpop.eup %6321  ;;  %v3417_v11 = vsel %vm2079_vm2, %v7248_v60, 0.0  ;;  %v7302_v47 = vpop.permute.xlu0 %1513  ;;  %v1679_v2 = vrot.slane %v1671_v41, %v6682_v51 }
 0x320   :  { %6335 = vpow2.f32 %v3404_v57  ;;  %v3423_v10 = vsel %vm2079_vm2, %v7250_v62, 0.0 }
 0x321   :  { %6337 = vpow2.f32 %v3398_v32  ;;  %v1735_v32 = vcombine.low %v1679_v2, %v1695_v61 }
 0x323   :  { %v7254_v43 = vpop.eup %6323  ;;  %3418 = vadd.xlane.f32.xlu0 %v3417_v11  ;;  %v1736_v11 = vcombine.high %v1679_v2, %v1695_v61 }
 0x324   :  { %v3438_v31 = vsel %vm2079_vm2, %v7254_v43, 0.0  ;;  %v7258_v63 = vpop.eup %6325 }
 0x325   :  { %3439 = vadd.xlane.f32.xlu1 %v3438_v31  ;;  %v3435_v55 = vsel %vm2079_vm2, %v7258_v63, 0.0 }
 0x327   :  { %3424 = vadd.xlane.f32.xlu0 %v3423_v10 }
 0x328   :  { %v7262_v12 = vpop.eup %6327 }
 0x329   :  { %v7264_v48 = vpop.eup %6329  ;;  %3436 = vadd.xlane.f32.xlu1 %v3435_v55  ;;  %v3447_v56 = vsel %vm2079_vm2, %v7262_v12, 0.0 }
 0x32a   :  { %v3444_v5 = vsel %vm2079_vm2, %v7264_v48, 0.0  ;;  %v7270_v24 = vpop.eup %6331 }
 0x32b   :  { %3445 = vadd.xlane.f32.xlu0 %v3444_v5  ;;  %v3429_v7 = vsel %vm2079_vm2, %v7270_v24, 0.0 }
 0x32c   :  { %v7274_v33 = vpop.eup %6333 }
 0x32d   :  { %3448 = vadd.xlane.f32.xlu1 %v3447_v56  ;;  %v3453_v44 = vsel %vm2079_vm2, %v7274_v33, 0.0  ;;  %v7280_v45 = vpop.eup %6335 }
 0x32e   :  { %v3450_v26 = vsel %vm2079_vm2, %v7280_v45, 0.0  ;;  %v7284_v40 = vpop.eup %6337 }
 0x32f   :  { %3430 = vadd.xlane.f32.xlu0 %v3429_v7  ;;  %v3441_v53 = vsel %vm2079_vm2, %v7284_v40, 0.0 }
 0x331   :  { %3454 = vadd.xlane.f32.xlu1 %v3453_v44 }
 0x333   :  { %3451 = vadd.xlane.f32.xlu0 %v3450_v26 }
 0x337   :  { %3442 = vadd.xlane.f32.xlu0 %v3441_v53 }
 0x342   :  { %1531 = vrot.lane.b32.xlu1 %v6671_v42, %s6502_s13 }
 0x34d   :  { %1525 = vrot.lane.b32.xlu0 %v6671_v42, %s6501_s12 }
 0x37f   :  { %v3410_v4 = vpop.xlane.xlu1 %3409 }
 0x380   :  { %6339 = vrcp.f32 %v3410_v4 }
 0x38d   :  { %v6340_v0 = vpop.eup %6339 }
 0x38e   :  { %v3472_v37 = vmul.f32 %v6340_v0, %v7207_v6  ;;  %v1672_v6 = vcombine.high %v6671_v42, %v7205_v25 }
 0x390   :  { %6093 = vmatmul.mubr.msk.f32.vlgmr.msra.gmra.mxu0 %vm2079_vm2, %v3472_v37  ;;  %v1686_v3 = vrot.slane %v1672_v6, %v6682_v51 }
 0x391   :  { %6101 = vmatpush3.msra.mxu0 %v1937_v34  ;;  %6102 = vmatprep.mubr.msk.f32.mxu0 %vm6495_vm0, %v6494_v1  ;;  %v1688_v34 = vcombine.high %v7202_v49, %v7209_v30  ;;  %v1743_v49 = vrot.slane %v1735_v32, %v6687_v58  ;;  %v1750_v30 = vrot.slane %v1736_v11, %v6687_v58 }
 0x392   :  { %6110 = vmatprep.subr.mxu0 %v6494_v1 }
 0x393   :  { %v1702_v16 = vrot.slane %v1688_v34, %v6682_v51  ;;  %v5783_v44 = vcombine.low %v1743_v49, %v1750_v30  ;;  %v5785_v26 = vcombine.high %v1743_v49, %v1750_v30 }
 0x395   :  { %v1751_v42 = vcombine.low %v1686_v3, %v1702_v16  ;;  %v1752_v25 = vcombine.high %v1686_v3, %v1702_v16  ;;  %v1967_v37 = vrot.slane %v5785_v26, %v6682_v51 }
 0x396   :  { %v3422_v13 = vpop.xlane.xlu1 %3421 }
 0x397   :  { %v1759_v10 = vrot.slane %v1751_v42, %v6687_v58  ;;  %v1766_v55 = vrot.slane %v1752_v25, %v6687_v58 }
 0x399   :  { %v5787_v53 = vcombine.low %v1759_v10, %v1766_v55  ;;  %v5789_v4 = vcombine.high %v1759_v10, %v1766_v55 }
 0x39a   :  { %v3413_v54 = vpop.xlane.xlu0 %3412 }
 0x39b   :  { %6341 = vrcp.f32 %v3413_v54  ;;  %v1983_v41 = vrot.slane %v5787_v53, %v6682_v51  ;;  %v1999_v54 = vrot.slane %v5789_v4, %v6682_v51 }
 0x39d   :  { %v2039_v2 = vcombine.low %v1983_v41, %v1999_v54  ;;  %v2040_v42 = vcombine.high %v1983_v41, %v1999_v54 }
 0x39e   :  { %v3428_v57 = vpop.xlane.xlu1 %3427 }
 0x39f   :  { %v7345_v32 = vrot.slane %v2039_v2, %v6687_v58 }
 0x3a2   :  { %v3416_v31 = vpop.xlane.xlu1 %3415 }
 0x3a3   :  { %6343 = vrcp.f32 %v3416_v31 }
 0x3a4   :  { %6345 = vrcp.f32 %v3422_v13 }
 0x3a5   :  { %6347 = vrcp.f32 %v3428_v57 }
 0x3a8   :  { %v6342_v5 = vpop.eup %6341  ;;  %v3434_v56 = vpop.xlane.xlu0 %3433 }
 0x3a9   :  { %v3473_v7 = vmul.f32 %v6342_v5, %v7224_v14  ;;  %6349 = vrcp.f32 %v3434_v56  ;;  %v1951_v14 = vrot.slane %v5783_v44, %v6682_v51 }
 0x3ab   :  { %6098 = vmatmul.mubr.msk.f32.vlgmr.msra.gmra.mxu1 %vm2079_vm2, %v3473_v7  ;;  %v2007_v13 = vcombine.low %v1951_v14, %v1967_v37  ;;  %v2008_v11 = vcombine.high %v1951_v14, %v1967_v37 }
 0x3ac   :  { %6106 = vmatpush3.msra.mxu1 %v1938_v29  ;;  %6107 = vmatprep.mubr.msk.f32.mxu1 %vm6495_vm0, %v6494_v1  ;;  %v3419_v0 = vpop.xlane.xlu0 %3418 }
 0x3ad   :  { %6115 = vmatprep.subr.mxu1 %v6494_v1  ;;  %6351 = vrcp.f32 %v3419_v0  ;;  %v7342_v57 = vrot.slane %v2007_v13, %v6687_v58  ;;  %v7358_v10 = vrot.slane %v2008_v11, %v6687_v58 }
 0x3ae   :  { %v3440_v6 = vpop.xlane.xlu1 %3439 }
 0x3af   :  { %6353 = vrcp.f32 %v3440_v6  ;;  %v2071_v30 = vcombine.low %v7342_v57, %v7345_v32  ;;  %v2072_v37 = vcombine.high %v7342_v57, %v7345_v32 }
 0x3b0   :  { %v6344_v27 = vpop.eup %6343  ;;  %v3425_v59 = vpop.xlane.xlu0 %3424 }
 0x3b1   :  { %6355 = vrcp.f32 %v3425_v59  ;;  %v3474_v28 = vmul.f32 %v6344_v27, %v7234_v21  ;;  %v6346_v29 = vpop.eup %6345 }
 0x3b2   :  { %v3437_v34 = vpop.xlane.xlu1 %3436  ;;  %v3476_v61 = vmul.f32 %v6346_v29, %v7218_v9  ;;  %v6348_v16 = vpop.eup %6347 }
 0x3b3   :  { %6103 = vmatmul.mubr.msk.f32.vlgmr.msra.gmra.mxu0 %vm2079_vm2, %v3474_v28  ;;  %v3478_v25 = vmul.f32 %v6348_v16, %v7230_v19 }
 0x3b4   :  { %v3446_v3 = vpop.xlane.xlu0 %3445  ;;  %6111 = vmatpush3.msra.mxu0 %v1939_v46  ;;  %6112 = vmatprep.mubr.msk.f32.mxu0 %vm6495_vm0, %v6494_v1 }
 0x3b5   :  { %6120 = vmatprep.subr.mxu0 %v6494_v1 }
 0x3b6   :  { %v3449_v21 = vpop.xlane.xlu1 %3448  ;;  %v6350_v9 = vpop.eup %6349 }
 0x3b7   :  { %6113 = vmatmul.mubr.msk.f32.vlgmr.msra.gmra.mxu0 %vm2079_vm2, %v3476_v61  ;;  %v3480_v56 = vmul.f32 %v6350_v9, %v7243_v50 }
 0x3b8   :  { %v3431_v46 = vpop.xlane.xlu0 %3430  ;;  %6121 = vmatpush3.msra.mxu0 %v1941_v52  ;;  %6122 = vmatprep.mubr.msk.f32.mxu0 %vm6495_vm0, %v6494_v1  ;;  %v7361_v52 = vrot.slane %v2040_v42, %v6687_v58 }
 0x3b9   :  { %6357 = vrcp.f32 %v3431_v46  ;;  %6130 = vmatprep.subr.mxu0 %v6494_v1 }
 0x3ba   :  { %v6352_v31 = vpop.eup %6351  ;;  %6359 = vrcp.f32 %v3437_v34  ;;  %v3455_v49 = vpop.xlane.xlu1 %3454  ;;  %v2074_v34 = vcombine.high %v7358_v10, %v7361_v52 }
 0x3bb   :  { %v3475_v55 = vmul.f32 %v6352_v31, %v7248_v60  ;;  %6123 = vmatmul.mubr.msk.f32.vlgmr.msra.gmra.mxu0 %vm2079_vm2, %v3478_v25  ;;  %v2073_v60 = vcombine.low %v7358_v10, %v7361_v52 }
 0x3bc   :  { %v3452_v5 = vpop.xlane.xlu0 %3451  ;;  %6131 = vmatpush3.msra.mxu0 %v2071_v30  ;;  %6132 = vmatprep.mubr.msk.f32.mxu0 %vm6495_vm0, %v6494_v1  ;;  %v6354_v19 = vpop.eup %6353 }
 0x3bd   :  { %6108 = vmatmul.mubr.msk.f32.vlgmr.msra.gmra.mxu1 %vm2079_vm2, %v3475_v55  ;;  %6140 = vmatprep.subr.mxu0 %v6494_v1  ;;  %v3482_v8 = vmul.f32 %v6354_v19, %v7254_v43 }
 0x3be   :  { %v6356_v7 = vpop.eup %6355  ;;  %6116 = vmatpush3.msra.mxu1 %v1940_v15  ;;  %6117 = vmatprep.mubr.msk.f32.mxu1 %vm6495_vm0, %v6494_v1  ;;  %v1532_v44 = vpop.permute.xlu1 %1531 }
 0x3bf   :  { %6125 = vmatprep.subr.mxu1 %v6494_v1  ;;  %v3477_v26 = vmul.f32 %v6356_v7, %v7250_v62  ;;  %6133 = vmatmul.mubr.msk.f32.vlgmr.msra.gmra.mxu0 %vm2079_vm2, %v3480_v56  ;;  %v1719_v23 = vcombine.low %v7292_v36, %v1532_v44  ;;  %v1720_v15 = vcombine.high %v7292_v36, %v1532_v44 }
 0x3c0   :  { %v3443_v53 = vpop.xlane.xlu0 %3442  ;;  %6141 = vmatpush3.msra.mxu0 %v2073_v60  ;;  %6142 = vmatprep.mubr.msk.f32.mxu0 %vm6495_vm0, %v6494_v1 }
 0x3c1   :  { %6118 = vmatmul.mubr.msk.f32.vlgmr.msra.gmra.mxu1 %vm2079_vm2, %v3477_v26  ;;  %6361 = vrcp.f32 %v3443_v53  ;;  %6150 = vmatprep.subr.mxu0 %v6494_v1  ;;  %v1727_v38 = vrot.slane %v1719_v23, %v6682_v51  ;;  %v1734_v36 = vrot.slane %v1720_v15, %v6682_v51 }
 0x3c2   :  { %6126 = vmatpush3.msra.mxu1 %v1942_v22  ;;  %6127 = vmatprep.mubr.msk.f32.mxu1 %vm6495_vm0, %v6494_v1  ;;  %6363 = vrcp.f32 %v3446_v3 }
 0x3c3   :  { %6143 = vmatmul.mubr.msk.f32.vlgmr.msra.gmra.mxu0 %vm2079_vm2, %v3482_v8  ;;  %6135 = vmatprep.subr.mxu1 %v6494_v1  ;;  %6365 = vrcp.f32 %v3449_v21 }
 0x3c4   :  { %v1526_v50 = vpop.permute.xlu0 %1525  ;;  %6152 = vmatprep.mubr.msk.f32.mxu0 %vm6495_vm0, %v6494_v1  ;;  %6367 = vrcp.f32 %v3455_v49 }
 0x3c5   :  { %v1703_v62 = vcombine.low %v7302_v47, %v1526_v50  ;;  %v1704_v43 = vcombine.high %v7302_v47, %v1526_v50  ;;  %6369 = vrcp.f32 %v3452_v5 }
 0x3c6   :  { %v6358_v39 = vpop.eup %6357 }
 0x3c7   :  { %v6360_v22 = vpop.eup %6359  ;;  %v1711_v4 = vrot.slane %v1703_v62, %v6682_v51  ;;  %v1718_v0 = vrot.slane %v1704_v43, %v6682_v51  ;;  %v3479_v14 = vmul.f32 %v6358_v39, %v7270_v24 }
 0x3c8   :  { %v3481_v27 = vmul.f32 %v6360_v22, %v7258_v63 }
 0x3c9   :  { %v1767_v41 = vcombine.low %v1711_v4, %v1727_v38  ;;  %v1768_v54 = vcombine.high %v1711_v4, %v1727_v38  ;;  %v1783_v47 = vcombine.low %v1718_v0, %v1734_v36  ;;  %v1784_v6 = vcombine.high %v1718_v0, %v1734_v36  ;;  %6128 = vmatmul.mubr.msk.f32.vlgmr.msra.gmra.mxu1 %vm2079_vm2, %v3479_v14 }
 0x3ca   :  { %6136 = vmatpush3.msra.mxu1 %v2072_v37  ;;  %6137 = vmatprep.mubr.msk.f32.mxu1 %vm6495_vm0, %v6494_v1 }
 0x3cb   :  { %v1775_v59 = vrot.slane %v1767_v41, %v6687_v58  ;;  %v1782_v24 = vrot.slane %v1768_v54, %v6687_v58  ;;  %v1791_v28 = vrot.slane %v1783_v47, %v6687_v58  ;;  %v1798_v29 = vrot.slane %v1784_v6, %v6687_v58  ;;  %6145 = vmatprep.subr.mxu1 %v6494_v1 }
 0x3cd   :  { %v5784_v13 = vcombine.low %v1775_v59, %v1782_v24  ;;  %v5786_v2 = vcombine.high %v1775_v59, %v1782_v24  ;;  %v5788_v3 = vcombine.low %v1791_v28, %v1798_v29  ;;  %v5790_v61 = vcombine.high %v1791_v28, %v1798_v29  ;;  %6138 = vmatmul.mubr.msk.f32.vlgmr.msra.gmra.mxu1 %vm2079_vm2, %v3481_v27 }
 0x3ce   :  { %v6362_v63 = vpop.eup %6361  ;;  %6146 = vmatpush3.msra.mxu1 %v2074_v34  ;;  %6147 = vmatprep.mubr.msk.f32.mxu1 %vm6495_vm0, %v6494_v1 }
 0x3cf   :  { %v1958_v16 = vrot.slane %v5784_v13, %v6682_v51  ;;  %v1974_v21 = vrot.slane %v5786_v2, %v6682_v51  ;;  %v1990_v57 = vrot.slane %v5788_v3, %v6682_v51  ;;  %v2006_v32 = vrot.slane %v5790_v61, %v6682_v51  ;;  %6155 = vmatprep.subr.mxu1 %v6494_v1  ;;  %v6364_v31 = vpop.eup %6363 }
 0x3d0   :  { %v3483_v11 = vmul.f32 %v6362_v63, %v7284_v40  ;;  %v6366_v49 = vpop.eup %6365  ;;  %v3484_v56 = vmul.f32 %v6364_v31, %v7264_v48 }
 0x3d1   :  { %v2023_v42 = vcombine.low %v1958_v16, %v1974_v21  ;;  %v2055_v46 = vcombine.low %v1990_v57, %v2006_v32  ;;  %v2024_v9 = vcombine.high %v1958_v16, %v1974_v21  ;;  %v2056_v25 = vcombine.high %v1990_v57, %v2006_v32  ;;  %v6368_v40 = vpop.eup %6367 }
 0x3d2   :  { %6148 = vmatmul.mubr.msk.f32.vlgmr.msra.gmra.mxu1 %vm2079_vm2, %v3483_v11  ;;  %v3485_v7 = vmul.f32 %v6366_v49, %v7262_v12  ;;  %v6370_v60 = vpop.eup %6369  ;;  %v3487_v48 = vmul.f32 %v6368_v40, %v7274_v33 }
 0x3d3   :  { %v2031_v30 = vrot.slane %v2023_v42, %v6687_v58  ;;  %v2063_v10 = vrot.slane %v2055_v46, %v6687_v58  ;;  %6157 = vmatprep.mubr.msk.f32.mxu1 %vm6495_vm0, %v6494_v1  ;;  %v2038_v52 = vrot.slane %v2024_v9, %v6687_v58  ;;  %v2070_v55 = vrot.slane %v2056_v25, %v6687_v58 }
 0x3d4   :  { %v3486_v53 = vmul.f32 %v6370_v60, %v7280_v45 }
 0x3d5   :  { %v2075_v5 = vcombine.low %v2031_v30, %v2063_v10  ;;  %v2076_v19 = vcombine.high %v2031_v30, %v2063_v10  ;;  %v2077_v44 = vcombine.low %v2038_v52, %v2070_v55  ;;  %v2078_v26 = vcombine.high %v2038_v52, %v2070_v55 }
 0x3d7   :  { %6151 = vmatpush3.msra.mxu0 %v2075_v5  ;;  %6156 = vmatpush3.msra.mxu1 %v2076_v19 }
 0x3d8   :  { %6153 = vmatmul.mubr.msk.f32.vlgmr.msra.gmra.mxu0 %vm2079_vm2, %v3484_v56  ;;  %6158 = vmatmul.mubr.msk.f32.vlgmr.msra.gmra.mxu1 %vm2079_vm2, %v3485_v7 }
 0x3d9   :  { %6160 = vmatprep.subr.mxu0 %v6494_v1  ;;  %6165 = vmatprep.subr.mxu1 %v6494_v1 }
 0x3da   :  { %6161 = vmatpush3.msra.mxu0 %v2077_v44  ;;  %6166 = vmatpush3.msra.mxu1 %v2078_v26 }
 0x3db   :  { %6162 = vmatprep.mubr.msk.f32.mxu0 %vm6495_vm0, %v6494_v1  ;;  %6167 = vmatprep.mubr.msk.f32.mxu1 %vm6495_vm0, %v6494_v1 }
 0x3dc   :  { %6163 = vmatmul.mubr.msk.f32.vlgmr.msra.gmra.mxu0 %vm2079_vm2, %v3486_v53  ;;  %6168 = vmatmul.mubr.msk.f32.vlgmr.msra.gmra.mxu1 %vm2079_vm2, %v3487_v48 }
 0x3dd   :  { %6170 = vmatprep.subr.bf16.mxu0 %v6494_v1  ;;  %6178 = vmatprep.mubr.msk.bf16.mxu0 %vm6495_vm0, %v6494_v1 }
 0x3de   :  { %6182 = vmatprep.subr.bf16.mxu1 %v6494_v1  ;;  %6190 = vmatprep.mubr.msk.bf16.mxu1 %vm6495_vm0, %v6494_v1 }
 0x450   :  { %v3557_v12 = vpop.f32.mrf.mxu0 }
 0x452   :  { %v6094_v33 = vpop.f32.mrf.mxu0 }
 0x46b   :  { %v3630_v45 = vpop.f32.mrf.mxu1 }
 0x46d   :  { %v6099_v8 = vpop.f32.mrf.mxu1 }
 0x473   :  { %v3703_v23 = vpop.f32.mrf.mxu0 }
 0x474   :  { %v4656_v39 = vcombine.low %v3557_v12, %v3703_v23  ;;  %v4657_v38 = vcombine.high %v3557_v12, %v3703_v23 }
 0x475   :  { %v6104_v15 = vpop.f32.mrf.mxu0 }
 0x476   :  { %v4664_v41 = vrot.slane %v4656_v39, %v6682_v51  ;;  %v4671_v54 = vrot.slane %v4657_v38, %v6682_v51 }
 0x477   :  { %v3849_v50 = vpop.f32.mrf.mxu0 }
 0x479   :  { %v6114_v62 = vpop.f32.mrf.mxu0 }
 0x47b   :  { %v3995_v43 = vpop.f32.mrf.mxu0 }
 0x47c   :  { %v4688_v30 = vcombine.low %v3849_v50, %v3995_v43  ;;  %v4689_v10 = vcombine.high %v3849_v50, %v3995_v43 }
 0x47d   :  { %v3776_v22 = vpop.f32.mrf.mxu1  ;;  %v6124_v36 = vpop.f32.mrf.mxu0 }
 0x47e   :  { %v4672_v4 = vcombine.low %v3630_v45, %v3776_v22  ;;  %v4673_v0 = vcombine.high %v3630_v45, %v3776_v22  ;;  %v4696_v53 = vrot.slane %v4688_v30, %v6682_v51  ;;  %v4703_v48 = vrot.slane %v4689_v10, %v6682_v51 }
 0x47f   :  { %v6109_v14 = vpop.f32.mrf.mxu1  ;;  %v4141_v37 = vpop.f32.mrf.mxu0 }
 0x480   :  { %v4680_v47 = vrot.slane %v4672_v4, %v6682_v51  ;;  %v4687_v6 = vrot.slane %v4673_v0, %v6682_v51 }
 0x481   :  { %v3922_v27 = vpop.f32.mrf.mxu1  ;;  %v6134_v59 = vpop.f32.mrf.mxu0 }
 0x482   :  { %v4720_v24 = vcombine.low %v4664_v41, %v4680_v47  ;;  %v4721_v28 = vcombine.high %v4664_v41, %v4680_v47  ;;  %v4736_v29 = vcombine.low %v4671_v54, %v4687_v6  ;;  %v4737_v34 = vcombine.high %v4671_v54, %v4687_v6 }
 0x483   :  { %v6119_v13 = vpop.f32.mrf.mxu1  ;;  %v4287_v2 = vpop.f32.mrf.mxu0 }
 0x484   :  { %v4728_v3 = vrot.slane %v4720_v24, %v6687_v58  ;;  %v4735_v61 = vrot.slane %v4721_v28, %v6687_v58  ;;  %v4744_v63 = vrot.slane %v4736_v29, %v6687_v58  ;;  %v4751_v16 = vrot.slane %v4737_v34, %v6687_v58 }
 0x485   :  { %v6144_v21 = vpop.f32.mrf.mxu0  ;;  %v4792_v50 = vcombine.low %v4141_v37, %v4287_v2  ;;  %v4793_v62 = vcombine.high %v4141_v37, %v4287_v2 }
 0x486   :  { %v5839_v57 = vcombine.low %v4728_v3, %v4735_v61  ;;  %v5841_v32 = vcombine.high %v4728_v3, %v4735_v61  ;;  %v5843_v11 = vcombine.low %v4744_v63, %v4751_v16  ;;  %v5845_v42 = vcombine.high %v4744_v63, %v4751_v16 }
 0x487   :  { %v4800_v47 = vrot.slane %v4792_v50, %v6682_v51  ;;  %v4807_v6 = vrot.slane %v4793_v62, %v6682_v51 }
 0x488   :  { %v4936_v46 = vrot.slane %v5839_v57, %v6682_v51  ;;  %v4952_v9 = vrot.slane %v5841_v32, %v6682_v51  ;;  %v4968_v25 = vrot.slane %v5843_v11, %v6682_v51  ;;  %v4984_v31 = vrot.slane %v5845_v42, %v6682_v51 }
 0x489   :  { %v4068_v49 = vpop.f32.mrf.mxu1 }
 0x48a   :  { %v4704_v52 = vcombine.low %v3922_v27, %v4068_v49  ;;  %v4705_v55 = vcombine.high %v3922_v27, %v4068_v49  ;;  %v4992_v5 = vcombine.low %v4936_v46, %v4952_v9  ;;  %v5024_v19 = vcombine.low %v4968_v25, %v4984_v31 }
 0x48b   :  { %v6129_v40 = vpop.f32.mrf.mxu1  ;;  %v4993_v39 = vcombine.high %v4936_v46, %v4952_v9  ;;  %v5025_v38 = vcombine.high %v4968_v25, %v4984_v31 }
 0x48c   :  { %v4712_v56 = vrot.slane %v4704_v52, %v6682_v51  ;;  %v4719_v7 = vrot.slane %v4705_v55, %v6682_v51  ;;  %v7467_v44 = vrot.slane %v4992_v5, %v6687_v58  ;;  %v7470_v26 = vrot.slane %v5024_v19, %v6687_v58 }
 0x48d   :  { %v4214_v60 = vpop.f32.mrf.mxu1  ;;  %v7485_v59 = vrot.slane %v4993_v39, %v6687_v58  ;;  %v7488_v24 = vrot.slane %v5025_v38, %v6687_v58 }
 0x48e   :  { %v5056_v33 = vcombine.low %v7467_v44, %v7470_v26  ;;  %v4752_v45 = vcombine.low %v4696_v53, %v4712_v56  ;;  %v4753_v8 = vcombine.high %v4696_v53, %v4712_v56  ;;  %v4768_v23 = vcombine.low %v4703_v48, %v4719_v7 }
 0x48f   :  { %v6139_v12 = vpop.f32.mrf.mxu1  ;;  %v4769_v15 = vcombine.high %v4703_v48, %v4719_v7  ;;  %v5058_v25 = vcombine.low %v7485_v59, %v7488_v24  ;;  %v5057_v31 = vcombine.high %v7467_v44, %v7470_v26 }
 0x490   :  { %v4760_v4 = vrot.slane %v4752_v45, %v6687_v58  ;;  %v4767_v0 = vrot.slane %v4753_v8, %v6687_v58  ;;  %v4776_v14 = vrot.slane %v4768_v23, %v6687_v58 }
 0x491   :  { %v4783_v41 = vrot.slane %v4769_v15, %v6687_v58 }
 0x492   :  { %v4360_v43 = vpop.f32.mrf.mxu1  ;;  %v5840_v2 = vcombine.low %v4760_v4, %v4767_v0  ;;  %v5842_v3 = vcombine.high %v4760_v4, %v4767_v0 }
 0x493   :  { %v4808_v22 = vcombine.low %v4214_v60, %v4360_v43  ;;  %v4809_v36 = vcombine.high %v4214_v60, %v4360_v43  ;;  %v5844_v61 = vcombine.low %v4776_v14, %v4783_v41  ;;  %v5846_v63 = vcombine.high %v4776_v14, %v4783_v41  ;;  %v6291_v41 = vld [vmem:[#allocation7 + $0x78] sm:$0xff]  }
 0x494   :  { %v6149_v54 = vpop.f32.mrf.mxu1  ;;  %v7499_v55 = vrot.slane %v5840_v2, %v6682_v51  ;;  %v7502_v40 = vrot.slane %v5842_v3, %v6682_v51  ;;  %6171 = vmatpush3.bf16.msra.mxu0 %v6291_v41 }
 0x495   :  { %v4816_v37 = vrot.slane %v4808_v22, %v6682_v51  ;;  %v4823_v27 = vrot.slane %v4809_v36, %v6682_v51  ;;  %v7505_v5 = vrot.slane %v5844_v61, %v6682_v51  ;;  %v7508_v19 = vrot.slane %v5846_v63, %v6682_v51  ;;  %6172 = vmatprep.subr.bf16.mxu0 %v6494_v1 }
 0x496   :  { %v5008_v63 = vcombine.low %v7499_v55, %v7502_v40 }
 0x497   :  { %v4856_v28 = vcombine.low %v4800_v47, %v4816_v37  ;;  %v4857_v29 = vcombine.high %v4800_v47, %v4816_v37  ;;  %v4872_v34 = vcombine.low %v4807_v6, %v4823_v27  ;;  %v4873_v13 = vcombine.high %v4807_v6, %v4823_v27 }
 0x498   :  { %v4433_v16 = vpop.f32.mrf.mxu0  ;;  %v4506_v21 = vpop.f32.mrf.mxu1 }
 0x499   :  { %v4864_v57 = vrot.slane %v4856_v28, %v6687_v58  ;;  %v4871_v32 = vrot.slane %v4857_v29, %v6687_v58  ;;  %v4880_v11 = vrot.slane %v4872_v34, %v6687_v58  ;;  %v4887_v42 = vrot.slane %v4873_v13, %v6687_v58  ;;  %v6292_v13 = vld [vmem:[#allocation7 + $0x70] sm:$0xff]  }
 0x49a   :  { %v6154_v46 = vpop.f32.mrf.mxu0  ;;  %v6159_v9 = vpop.f32.mrf.mxu1  ;;  %6173 = vmatpush3.bf16.msra.mxu0 %v6292_v13 }
 0x49b   :  { %v5847_v49 = vcombine.low %v4864_v57, %v4871_v32  ;;  %v5849_v30 = vcombine.high %v4864_v57, %v4871_v32  ;;  %v5851_v10 = vcombine.low %v4880_v11, %v4887_v42  ;;  %v5853_v52 = vcombine.high %v4880_v11, %v4887_v42  ;;  %6174 = vmatprep.subr.bf16.mxu0 %v6494_v1 }
 0x49c   :  { %v4579_v56 = vpop.f32.mrf.mxu0  ;;  %v4652_v7 = vpop.f32.mrf.mxu1  ;;  %v5040_v9 = vcombine.low %v7505_v5, %v7508_v19 }
 0x49d   :  { %v5072_v60 = vrot.slane %v5847_v49, %v6682_v51  ;;  %v5088_v53 = vrot.slane %v5849_v30, %v6682_v51  ;;  %v5104_v48 = vrot.slane %v5851_v10, %v6682_v51  ;;  %v5120_v12 = vrot.slane %v5853_v52, %v6682_v51 }
 0x49e   :  { %v4824_v45 = vcombine.low %v4433_v16, %v4579_v56  ;;  %v4825_v8 = vcombine.high %v4433_v16, %v4579_v56  ;;  %v4840_v23 = vcombine.low %v4506_v21, %v4652_v7  ;;  %v4841_v15 = vcombine.high %v4506_v21, %v4652_v7  ;;  %v6164_v50 = vpop.f32.mrf.mxu0  ;;  %v6169_v62 = vpop.f32.mrf.mxu1 }
 0x49f   :  { %v5129_v43 = vcombine.high %v5072_v60, %v5088_v53  ;;  %v5161_v39 = vcombine.high %v5104_v48, %v5120_v12  ;;  %v5128_v38 = vcombine.low %v5072_v60, %v5088_v53  ;;  %v5160_v22 = vcombine.low %v5104_v48, %v5120_v12 }
 0x4a0   :  { %v4832_v36 = vrot.slane %v4824_v45, %v6682_v51  ;;  %v4839_v4 = vrot.slane %v4825_v8, %v6682_v51  ;;  %v4848_v0 = vrot.slane %v4840_v23, %v6682_v51  ;;  %v4855_v14 = vrot.slane %v4841_v15, %v6682_v51 }
 0x4a1   :  { %v5143_v54 = vrot.slane %v5129_v43, %v6687_v58  ;;  %v5175_v47 = vrot.slane %v5161_v39, %v6687_v58  ;;  %v7521_v6 = vrot.slane %v5128_v38, %v6687_v58  ;;  %v7524_v37 = vrot.slane %v5160_v22, %v6687_v58 }
 0x4a2   :  { %v4888_v27 = vcombine.low %v4832_v36, %v4848_v0  ;;  %v4889_v28 = vcombine.high %v4832_v36, %v4848_v0  ;;  %v4904_v29 = vcombine.low %v4839_v4, %v4855_v14  ;;  %v4905_v34 = vcombine.high %v4839_v4, %v4855_v14 }
 0x4a3   :  { %v5194_v2 = vcombine.low %v5143_v54, %v5175_v47  ;;  %v5193_v3 = vcombine.high %v7521_v6, %v7524_v37  ;;  %v5192_v61 = vcombine.low %v7521_v6, %v7524_v37  ;;  %v5195_v46 = vcombine.high %v5143_v54, %v5175_v47 }
 0x4a4   :  { %v4896_v16 = vrot.slane %v4888_v27, %v6687_v58  ;;  %v4903_v21 = vrot.slane %v4889_v28, %v6687_v58  ;;  %v4912_v57 = vrot.slane %v4904_v29, %v6687_v58  ;;  %v4919_v32 = vrot.slane %v4905_v34, %v6687_v58 }
 0x4a5   :  { %v6249_v11 = vpack.i.bf16 %v5194_v2, %v5058_v25  ;;  %v6244_v42 = vpack.i.bf16 %v5193_v3, %v5057_v31  ;;  %v5059_v56 = vcombine.high %v7485_v59, %v7488_v24  ;;  %v5009_v25 = vcombine.high %v7499_v55, %v7502_v40  ;;  %v6293_v31 = vld [vmem:[#allocation7 + $0x68] sm:$0xff]  }
 0x4a6   :  { %v5848_v49 = vcombine.low %v4896_v16, %v4903_v21  ;;  %v5850_v30 = vcombine.high %v4896_v16, %v4903_v21  ;;  %v5852_v10 = vcombine.low %v4912_v57, %v4919_v32  ;;  %v5854_v52 = vcombine.high %v4912_v57, %v4919_v32  ;;  %6175 = vmatpush3.bf16.msra.mxu0 %v6293_v31 }
 0x4a7   :  { %6250 = vrot.lane.b32.xlu1 %v6249_v11, %s6505_s14  ;;  %6245 = vrot.lane.b32.xlu0 %v6244_v42, %s6492_s29  ;;  %v6254_v12 = vpack.i.bf16 %v5195_v46, %v5059_v56  ;;  %v5016_v45 = vrot.slane %v5008_v63, %v6687_v58  ;;  %v5048_v8 = vrot.slane %v5040_v9, %v6687_v58 }
 0x4a8   :  { %v5079_v7 = vrot.slane %v5848_v49, %v6682_v51  ;;  %v5095_v60 = vrot.slane %v5850_v30, %v6682_v51  ;;  %v5111_v53 = vrot.slane %v5852_v10, %v6682_v51  ;;  %v5127_v48 = vrot.slane %v5854_v52, %v6682_v51  ;;  %6176 = vmatprep.subr.bf16.mxu0 %v6494_v1 }
 0x4a9   :  { %v5041_v59 = vcombine.high %v7505_v5, %v7508_v19  ;;  %v5023_v43 = vrot.slane %v5009_v25, %v6687_v58  ;;  %v6294_v19 = vld [vmem:[#allocation7 + $0x60] sm:$0xff]   ;;  %v5061_v39 = vcombine.high %v5016_v45, %v5048_v8  ;;  %v5060_v22 = vcombine.low %v5016_v45, %v5048_v8 }
 0x4aa   :  { %v5144_v24 = vcombine.low %v5079_v7, %v5095_v60  ;;  %v5176_v55 = vcombine.low %v5111_v53, %v5127_v48  ;;  %v5145_v40 = vcombine.high %v5079_v7, %v5095_v60  ;;  %v5177_v23 = vcombine.high %v5111_v53, %v5127_v48  ;;  %6177 = vmatpush3.bf16.msra.mxu0 %v6294_v19 }
 0x4ab   :  { %6255 = vrot.lane.b32.xlu0 %v6254_v12, %s6506_s15  ;;  %v5055_v5 = vrot.slane %v5041_v59, %v6687_v58  ;;  %6194 = vmatprep.subr.bf16.mxu0 %v6494_v1 }
 0x4ac   :  { %v5152_v51 = vrot.slane %v5144_v24, %v6687_v58  ;;  %v5184_v15 = vrot.slane %v5176_v55, %v6687_v58  ;;  %v5159_v50 = vrot.slane %v5145_v40, %v6687_v58  ;;  %v5191_v62 = vrot.slane %v5177_v23, %v6687_v58  ;;  %v7573_v55 = vld [vmem:[#allocation9] sm:$0xff] }
 0x4ad   :  { %v5063_v54 = vcombine.high %v5023_v43, %v5055_v5  ;;  %v5062_v47 = vcombine.low %v5023_v43, %v5055_v5  ;;  %v5288_v24 = vsub.s32 3, %v6582_v17  ;;  %v7579_v5 = vld [vmem:[#allocation6] sm:$0xff] }
 0x4ae   :  { %v5197_v38 = vcombine.high %v5152_v51, %v5184_v15  ;;  %v5196_v36 = vcombine.low %v5152_v51, %v5184_v15  ;;  %v5199_v14 = vcombine.high %v5159_v50, %v5191_v62  ;;  %v5198_v41 = vcombine.low %v5159_v50, %v5191_v62 }
 0x4af   :  { %v5289_v40 = vrot.slane %v7573_v55, %v5288_v24  ;;  %v7576_v51 = vstv %s5727_s20 }
 0x4b0   :  { %v6264_v4 = vpack.i.bf16 %v5197_v38, %v5061_v39  ;;  %v6259_v0 = vpack.i.bf16 %v5196_v36, %v5060_v22  ;;  %v6274_v27 = vpack.i.bf16 %v5199_v14, %v5063_v54  ;;  %v6269_v58 = vpack.i.bf16 %v5198_v41, %v5062_v47 }
 0x4b2   :  { %6265 = vrot.lane.b32.xlu0 %v6264_v4, %s6507_s16  ;;  %6260 = vrot.lane.b32.xlu1 %v6259_v0, %s6508_s17  ;;  %v7587_v4 = vld [vmem:[#allocation6 + $0x8] sm:$0xff] }
 0x4b6   :  { %6275 = vrot.lane.b32.xlu0 %v6274_v27, %s6509_s18  ;;  %6270 = vrot.lane.b32.xlu1 %v6269_v58, %s6510_s19 }
 0x519   :  { %v6246_v28 = vpop.permute.xlu0 %6245  ;;  %v6251_v29 = vpop.permute.xlu1 %6250 }
 0x51a   :  { %v6248_v34 = vunpack.i.h.bf16 %v6246_v28  ;;  %v6247_v13 = vunpack.i.l.bf16 %v6246_v28  ;;  %v6253_v3 = vunpack.i.h.bf16 %v6251_v29  ;;  %v6252_v63 = vunpack.i.l.bf16 %v6251_v29 }
 0x51c   :  { %v5256_v16 = vsel %vm2079_vm2, %v5056_v33, %v6247_v13  ;;  %v5257_v21 = vsel %vm2079_vm2, %v5192_v61, %v6248_v34 }
 0x51d   :  { %v6256_v2 = vpop.permute.xlu0 %6255  ;;  %v5259_v46 = vsel %vm5258_vm3, %v5256_v16, %v6252_v63  ;;  %v5260_v9 = vsel %vm5258_vm3, %v5257_v21, %v6253_v3  ;;  %v6295_v3 = vld [vmem:[#allocation7 + $0x98] sm:$0xff]   ;;  %v6296_v63 = vld [vmem:[#allocation7 + $0x90] sm:$0xff]   ;;  %v6297_v16 = vld [vmem:[#allocation7 + $0x88] sm:$0xff]  }
 0x51e   :  { %v6258_v57 = vunpack.i.h.bf16 %v6256_v2  ;;  %v6257_v32 = vunpack.i.l.bf16 %v6256_v2  ;;  %6183 = vmatpush3.bf16.msra.mxu1 %v6295_v3  ;;  %v6298_v21 = vld [vmem:[#allocation7 + $0x80] sm:$0xff]  }
 0x51f   :  { %6184 = vmatprep.subr.bf16.mxu1 %v6494_v1 }
 0x520   :  { %v5262_v10 = vsel %vm5261_vm4, %v5259_v46, %v6257_v32  ;;  %v5263_v52 = vsel %vm5261_vm4, %v5260_v9, %v6258_v57 }
 0x522   :  { %6185 = vmatpush3.bf16.msra.mxu1 %v6296_v63 }
 0x523   :  { %6186 = vmatprep.subr.bf16.mxu1 %v6494_v1 }
 0x524   :  { %v6266_v11 = vpop.permute.xlu0 %6265  ;;  %v6261_v42 = vpop.permute.xlu1 %6260 }
 0x525   :  { %v6263_v49 = vunpack.i.h.bf16 %v6261_v42  ;;  %v6262_v30 = vunpack.i.l.bf16 %v6261_v42  ;;  %v6268_v44 = vunpack.i.h.bf16 %v6266_v11  ;;  %v6267_v26 = vunpack.i.l.bf16 %v6266_v11 }
 0x526   :  { %6187 = vmatpush3.bf16.msra.mxu1 %v6297_v16 }
 0x527   :  { %v5266_v33 = vsel %vm5264_vm5, %v5263_v52, %v6263_v49  ;;  %v5265_v56 = vsel %vm5264_vm5, %v5262_v10, %v6262_v30  ;;  %6188 = vmatprep.subr.bf16.mxu1 %v6494_v1  ;;  %v5391_v49 = vsub.s32 4, %v6582_v17 }
 0x528   :  { %v6276_v6 = vpop.permute.xlu0 %6275  ;;  %v6271_v37 = vpop.permute.xlu1 %6270  ;;  %v5268_v60 = vsel %vm5267_vm6, %v5265_v56, %v6267_v26  ;;  %v5269_v53 = vsel %vm5267_vm6, %v5266_v33, %v6268_v44  ;;  %v5397_v44 = vsub.s32 5, %v6582_v17 }
 0x529   :  { %v6278_v61 = vunpack.i.h.bf16 %v6276_v6  ;;  %v6277_v25 = vunpack.i.l.bf16 %v6276_v6  ;;  %v6273_v31 = vunpack.i.h.bf16 %v6271_v37  ;;  %v6272_v7 = vunpack.i.l.bf16 %v6271_v37 }
 0x52a   :  { %6189 = vmatpush3.bf16.msra.mxu1 %v6298_v21  ;;  %v5392_v52 = vrot.slane %v7573_v55, %v5391_v49  ;;  %v5398_v6 = vrot.slane %v7573_v55, %v5397_v44  ;;  %v6305_v44 = vld [vmem:[#allocation7 + $0xc8] sm:$0xff]  }
 0x52b   :  { %v5271_v48 = vsel %vm5270_vm7, %v5268_v60, %v6272_v7  ;;  %v5272_v12 = vsel %vm5270_vm7, %v5269_v53, %v6273_v31  ;;  %6206 = vmatprep.subr.bf16.mxu1 %v6494_v1  ;;  %v6299_v7 = vld [vmem:[#allocation7 + $0xb8] sm:$0xff]   ;;  %v6300_v60 = vld [vmem:[#allocation7 + $0xb0] sm:$0xff]   ;;  %v6301_v53 = vld [vmem:[#allocation7 + $0xa8] sm:$0xff]  }
 0x52c   :  { %v5274_v45 = vsel %vm5273_vm8, %v5271_v48, %v6277_v25  ;;  %v5275_v8 = vsel %vm5273_vm8, %v5272_v12, %v6278_v61  ;;  %v6302_v48 = vld [vmem:[#allocation7 + $0xa0] sm:$0xff]   ;;  %v5413_v12 = vsub.s32 6, %v6582_v17 }
 0x52d   :  { %v5276_v59 = vpack.c.bf16 %v5275_v8, %v5274_v45 }
 0x52e   :  { %v5414_v45 = vrot.slane %v7573_v55, %v5413_v12 }
 0x52f   :  { %6179 = vmatmul.mubr.msk.bf16.vlgmr.msra.gmra.mxu0 %vm114_vm1, %v5276_v59 }
 0x530   :  { %6202 = vmatprep.mubr.msk.bf16.mxu0 %vm6495_vm0, %v6494_v1  ;;  %6195 = vmatpush3.bf16.msra.mxu0 %v6299_v7 }
 0x531   :  { %6196 = vmatprep.subr.bf16.mxu0 %v6494_v1 }
 0x534   :  { %6197 = vmatpush3.bf16.msra.mxu0 %v6300_v60 }
 0x535   :  { %6198 = vmatprep.subr.bf16.mxu0 %v6494_v1 }
 0x538   :  { %6199 = vmatpush3.bf16.msra.mxu0 %v6301_v53 }
 0x539   :  { %6200 = vmatprep.subr.bf16.mxu0 %v6494_v1 }
 0x53c   :  { %6201 = vmatpush3.bf16.msra.mxu0 %v6302_v48 }
 0x5ef   :  { %v5351_v23 = vpop.f32.mrf.mxu0 }
 0x5f0   :  { %v5352_v15 = vadd.f32 %v5351_v23, %v5289_v40 }
 0x5f1   :  { %v6180_v50 = vpop.f32.mrf.mxu0 }
 0x5f2   :  { %v5359_v62 = vmul.f32 %v7576_v51, %v5352_v15 }
 0x5f3   :  { %v5354_v43 = vpop.f32.mrf.mxu0 }
 0x5f4   :  { %v7582_v19 = vadd.f32 %v7579_v5, %v5359_v62  ;;  %v5355_v39 = vadd.f32 %v5354_v43, %v5289_v40 }
 0x5f5   :  { %v6181_v38 = vpop.f32.mrf.mxu0 }
 0x5f6   :  { %v5360_v22 = vmul.f32 %v7576_v51, %v5355_v39  ;;  %v5363_v36 = vsel %vm114_vm1, %v7582_v19, 0.0 }
 0x5f7   :  { %5364 = vadd.xlane.f32.xlu1 %v5363_v36 }
 0x5f8   :  { %v7590_v0 = vadd.f32 %v7587_v4, %v5360_v22 }
 0x5fa   :  { %v5366_v14 = vsel %vm114_vm1, %v7590_v0, 0.0 }
 0x5fb   :  { %5367 = vadd.xlane.f32.xlu0 %v5366_v14 }
 0x680   :  { %v5365_v41 = vpop.xlane.xlu1 %5364 }
 0x681   :  { %v5369_v54 = vmul.f32 0.015625, %v5365_v41 }
 0x683   :  { %v5371_v47 = vsub.f32 %v7582_v19, %v5369_v54 }
 0x684   :  { %v5368_v27 = vpop.xlane.xlu0 %5367 }
 0x685   :  { %v5370_v58 = vmul.f32 0.015625, %v5368_v27  ;;  %v5373_v28 = vmul.f32 %v5371_v47, %v5371_v47  ;;  %v5505_v27 = vsub.s32 7, %v6582_v17 }
 0x687   :  { %v5372_v29 = vsub.f32 %v7590_v0, %v5370_v58  ;;  %v5375_v34 = vsel %vm114_vm1, %v5373_v28, 0.0  ;;  %v5506_v58 = vrot.slane %v7573_v55, %v5505_v27 }
 0x688   :  { %5376 = vadd.xlane.f32.xlu0 %v5375_v34 }
 0x689   :  { %v5374_v13 = vmul.f32 %v5372_v29, %v5372_v29 }
 0x68b   :  { %v5378_v2 = vsel %vm114_vm1, %v5374_v13, 0.0 }
 0x68c   :  { %5379 = vadd.xlane.f32.xlu1 %v5378_v2 }
 0x711   :  { %v5377_v57 = vpop.xlane.xlu0 %5376 }
 0x712   :  { %v5381_v32 = vmul.f32 0.015625, %v5377_v57 }
 0x714   :  { %v5383_v11 = vadd.f32 1e-05, %v5381_v32 }
 0x715   :  { %v5380_v42 = vpop.xlane.xlu1 %5379 }
 0x716   :  { %6371 = vrsqrt.f32 %v5383_v11  ;;  %v5382_v46 = vmul.f32 0.015625, %v5380_v42 }
 0x718   :  { %v5384_v9 = vadd.f32 1e-05, %v5382_v46 }
 0x71a   :  { %6373 = vrsqrt.f32 %v5384_v9 }
 0x723   :  { %v6372_v30 = vpop.eup %6371 }
 0x724   :  { %v5387_v10 = vmul.f32 %v6372_v30, %v5371_v47 }
 0x726   :  { %v5393_v56 = vmul.f32 %v5392_v52, %v5387_v10  ;;  %v6303_v10 = vld [vmem:[#allocation7 + $0xd8] sm:$0xff]  }
 0x727   :  { %v6374_v26 = vpop.eup %6373 }
 0x728   :  { %v5388_v33 = vmul.f32 %v6374_v26, %v5372_v29  ;;  %v5399_v61 = vadd.f32 %v5398_v6, %v5393_v56  ;;  %v6306_v26 = vld [vmem:[#allocation7 + $0xc0] sm:$0xff]  }
 0x72a   :  { %v5394_v37 = vmul.f32 %v5392_v52, %v5388_v33  ;;  %v6304_v52 = vld [vmem:[#allocation7 + $0xd0] sm:$0xff]  }
 0x72c   :  { %v5400_v25 = vadd.f32 %v5398_v6, %v5394_v37 }
 0x72e   :  { %v5401_v31 = vpack.c.bf16 %v5400_v25, %v5399_v61 }
 0x730   :  { %6191 = vmatmul.mubr.msk.bf16.vlgmr.msra.gmra.mxu1 %vm114_vm1, %v5401_v31  ;;  %v77_v31 = vld [vmem:[#allocation9 + $0x8] sm:$0x7] }
 0x731   :  { %6214 = vmatprep.mubr.msk.bf16.mxu1 %vm6495_vm0, %v6494_v1  ;;  %6207 = vmatpush3.bf16.msra.mxu1 %v6303_v10  ;;  %v5604_v7 = vrot.slane %v77_v31, %v88_v20  ;;  %v5610_v53 = vrot.slane %v77_v31, %v758_v18 }
 0x732   :  { %6208 = vmatprep.subr.bf16.mxu1 %v6494_v1 }
 0x735   :  { %6209 = vmatpush3.bf16.msra.mxu1 %v6304_v52 }
 0x736   :  { %6210 = vmatprep.subr.bf16.mxu1 %v6494_v1 }
 0x739   :  { %6211 = vmatpush3.bf16.msra.mxu1 %v6305_v44 }
 0x73a   :  { %6212 = vmatprep.subr.bf16.mxu1 %v6494_v1 }
 0x73d   :  { %6213 = vmatpush3.bf16.msra.mxu1 %v6306_v26 }
 0x7f0   :  { %v5476_v8 = vpop.f32.mrf.mxu1 }
 0x7f1   :  { %v5477_v59 = vadd.f32 %v5476_v8, %v5414_v45 }
 0x7f2   :  { %v6192_v24 = vpop.f32.mrf.mxu1 }
 0x7f3   :  { %v5485_v40 = vmul.f32 0.70710677, %v5477_v59  ;;  %v5483_v22 = vmul.f32 0.5, %v5477_v59 }
 0x7f4   :  { %v5479_v23 = vpop.f32.mrf.mxu1 }
 0x7f5   :  { %6375 = verf.f32 %v5485_v40  ;;  %v5480_v15 = vadd.f32 %v5479_v23, %v5414_v45  ;;  %v5613_v45 = vstv %s71_s21  ;;  %v5618_v23 = vmul.f32 %v7582_v19, %v7576_v51 }
 0x7f6   :  { %v6193_v50 = vpop.f32.mrf.mxu1 }
 0x7f7   :  { %v5486_v62 = vmul.f32 0.70710677, %v5480_v15  ;;  %v5484_v36 = vmul.f32 0.5, %v5480_v15 }
 0x7f9   :  { %6377 = verf.f32 %v5486_v62 }
 0x802   :  { %v6376_v43 = vpop.eup %6375 }
 0x803   :  { %v5489_v39 = vadd.f32 1.0, %v6376_v43  ;;  %v5619_v43 = vmul.f32 %v7590_v0, %v7576_v51 }
 0x805   :  { %v5491_v41 = vmul.f32 %v5489_v39, %v5483_v22  ;;  %v5635_v22 = vrot.slane %v77_v31, %v1424_v35 }
 0x806   :  { %v6378_v38 = vpop.eup %6377 }
 0x807   :  { %v5490_v14 = vadd.f32 1.0, %v6378_v38 }
 0x809   :  { %v5492_v54 = vmul.f32 %v5490_v14, %v5484_v36 }
 0x80b   :  { %v5493_v47 = vpack.c.bf16 %v5492_v54, %v5491_v41 }
 0x80d   :  { %6203 = vmatmul.mubr.msk.bf16.vlgmr.msra.gmra.mxu0 %vm114_vm1, %v5493_v47 }
 0x8cd   :  { %v5568_v28 = vpop.f32.mrf.mxu0 }
 0x8ce   :  { %v5569_v29 = vadd.f32 %v5568_v28, %v5506_v58 }
 0x8cf   :  { %v6204_v34 = vpop.f32.mrf.mxu0 }
 0x8d0   :  { %v5575_v13 = vsel %vm114_vm1, %v5569_v29, 0.0 }
 0x8d1   :  { %5576 = vadd.xlane.f32.xlu0 %v5575_v13  ;;  %v5571_v2 = vpop.f32.mrf.mxu0 }
 0x8d2   :  { %v5572_v3 = vadd.f32 %v5571_v2, %v5506_v58 }
 0x8d3   :  { %v6205_v63 = vpop.f32.mrf.mxu0 }
 0x8d4   :  { %v5578_v16 = vsel %vm114_vm1, %v5572_v3, 0.0 }
 0x8d5   :  { %5579 = vadd.xlane.f32.xlu1 %v5578_v16 }
 0x95a   :  { %v5577_v21 = vpop.xlane.xlu0 %5576 }
 0x95b   :  { %v5581_v57 = vmul.f32 0.015625, %v5577_v21 }
 0x95d   :  { %v5583_v32 = vsub.f32 %v5569_v29, %v5581_v57 }
 0x95e   :  { %v5580_v11 = vpop.xlane.xlu1 %5579 }
 0x95f   :  { %v5582_v42 = vmul.f32 0.015625, %v5580_v11  ;;  %v5585_v46 = vmul.f32 %v5583_v32, %v5583_v32 }
 0x961   :  { %v5584_v9 = vsub.f32 %v5572_v3, %v5582_v42  ;;  %v5587_v55 = vsel %vm114_vm1, %v5585_v46, 0.0 }
 0x962   :  { %5588 = vadd.xlane.f32.xlu0 %v5587_v55 }
 0x963   :  { %v5586_v49 = vmul.f32 %v5584_v9, %v5584_v9 }
 0x965   :  { %v5590_v30 = vsel %vm114_vm1, %v5586_v49, 0.0 }
 0x966   :  { %5591 = vadd.xlane.f32.xlu1 %v5590_v30 }
 0x9eb   :  { %v5589_v33 = vpop.xlane.xlu0 %5588 }
 0x9ec   :  { %v5593_v56 = vmul.f32 0.015625, %v5589_v33 }
 0x9ee   :  { %v5595_v6 = vadd.f32 1e-05, %v5593_v56 }
 0x9ef   :  { %v5592_v37 = vpop.xlane.xlu1 %5591 }
 0x9f0   :  { %6379 = vrsqrt.f32 %v5595_v6  ;;  %v5594_v61 = vmul.f32 0.015625, %v5592_v37 }
 0x9f2   :  { %v5596_v25 = vadd.f32 1e-05, %v5594_v61 }
 0x9f4   :  { %6381 = vrsqrt.f32 %v5596_v25 }
 0x9fd   :  { %v6380_v60 = vpop.eup %6379 }
 0x9fe   :  { %v5599_v48 = vmul.f32 %v6380_v60, %v5583_v32 }
 0xa00   :  { %v5605_v1 = vmul.f32 %v5604_v7, %v5599_v48 }
 0xa01   :  { %v6382_v12 = vpop.eup %6381 }
 0xa02   :  { %v5611_v8 = vadd.f32 %v5610_v53, %v5605_v1  ;;  %v5600_v59 = vmul.f32 %v6382_v12, %v5584_v9 }
 0xa04   :  { %v5606_v24 = vmul.f32 %v5604_v7, %v5600_v59  ;;  %v5614_v40 = vmul.f32 %v5613_v45, %v5611_v8 }
 0xa06   :  { %v5612_v15 = vadd.f32 %v5610_v53, %v5606_v24  ;;  %v5616_v50 = vadd.f32 %v7579_v5, %v5614_v40 }
 0xa08   :  { %v5615_v62 = vmul.f32 %v5613_v45, %v5612_v15  ;;  %v5620_v20 = vadd.f32 %v5618_v23, %v5616_v50 }
 0xa0a   :  { %v5617_v18 = vadd.f32 %v7587_v4, %v5615_v62 }
 0xa0c   :  { %v5621_v39 = vadd.f32 %v5619_v43, %v5617_v18 }
 0xa0e   :  { %v5622_v38 = vpack.c.bf16 %v5621_v39, %v5620_v20 }
 0xa10   :  { %6215 = vmatmul.mubr.msk.bf16.vlgmr.msra.gmra.mxu1 %vm114_vm1, %v5622_v38 }
 0xad0   :  { %v5697_v36 = vpop.f32.mrf.mxu1 }
 0xad1   :  { %v5698_v14 = vadd.f32 %v5697_v36, %v5635_v22 }
 0xad2   :  { %v6216_v19 = vpop.f32.mrf.mxu1 }
 0xad3   :  { %6383 = vtanh.f32 %v5698_v14 }
 0xad4   :  { %v5700_v41 = vpop.f32.mrf.mxu1 }
 0xad5   :  { %v5701_v5 = vadd.f32 %v5700_v41, %v5635_v22 }
 0xad6   :  { %v6217_v54 = vpop.f32.mrf.mxu1 }
 0xad7   :  { %6385 = vtanh.f32 %v5701_v5 }
 0xae0   :  { %v6384_v47 = vpop.eup %6383 }
 0xae1   :  { %5706 = vst.msk [vmem:[#allocation10] sm:$0xff] %vm114_vm1, %v6384_v47 }
 0xae4   :  { %v6386_v51 = vpop.eup %6385 }
 0xae5   :  { %5707 = vst.msk [vmem:[#allocation10 + $0x8] sm:$0xff] %vm114_vm1, %v6386_v51 }
 0xae6   :  { %6469 = shalt.err (!%p6466_p5)
}
 0xae7   :  { %5719 = dma.vmem_to_hbm [thread:$0]  %s5714_s23, 256, %s7649_s4, [#allocation4], %s6491_s28, %s6491_s28, %s6492_s29  }
 0xae8   :  { %6484 = dma.done.wait [#allocation4], 256  }
 0xae9   :  { %6485 = vsyncadd [#allocation4], 4294967040 }
 0xaea   :  { %5723 = vsyncpa [#allocation3], 1 }
 0xaeb   :  { %5724 = vsyncpa [#allocation8], 1 }
 0xaec   :  { %5725 = vsyncpa [#allocation4], 1 }
 0xaed   :  { %5726 = vsyncpa [#allocation5], 1 }

</bundles_post_ra>
